<compile_context>
chip_gen: v5e
topology: v5e:2x2
jax: 0.10.0
libtpu: 0.0.40
codegen_flags: <defaults>
</compile_context>

<pallas_src>
import numpy as np
import jax
import jax.numpy as jnp
from jax.experimental import pallas as pl
from jax.experimental.pallas import tpu as pltpu

# Map-channel constants (home-robot MapConstants semantics).
NON_SEM_CHANNELS = 6
EXPLORED_MAP = 1
BEEN_CLOSE_MAP = 4
BLACKLISTED_TARGETS_MAP = 5


def _disk(radius):
    r = np.arange(-radius, radius + 1)
    X, Y = np.meshgrid(r, r)
    return (X * X + Y * Y <= radius * radius).astype(np.float32)


DISK10 = _disk(10)                      # explore_kernel: morph.disk(10) -> 21x21
DISK1 = _disk(1)                        # border_kernel:  morph.disk(1)  -> 3x3
ONES15 = np.ones((15, 15), np.float32)  # info-gain kernel


# ----------------------- static row decomposition ----------------------------
def _decompose(k_np):
    """Group rows of a 0/1 kernel (each row a centered run of ones) by half-width.

    Returns [(r, (dy, ...)), ...] such that
      conv_K(X) == sum_r sum_{dy in dys_r} vshift_dy( hbox_r(X) )
    where hbox_r is the horizontal box filter of half-width r and vshift_dy is
    the zero-padded vertical shift by dy.
    """
    K, Kc = k_np.shape
    p = K // 2
    # f32 accumulation of 0/1 products is exact for integer counts < 2**24;
    # guard it so a future (much) larger radius cannot silently round before
    # the > 0.5 threshold.
    assert int(k_np.sum()) < (1 << 24)
    groups = {}
    for a in range(K):
        row = np.asarray(k_np[a])
        s = int(row.sum())
        if s == 0:
            continue
        r = (s - 1) // 2
        expect = (np.abs(np.arange(Kc) - Kc // 2) <= r)
        assert np.array_equal(row.astype(bool), expect), "row is not a centered run"
        groups.setdefault(r, []).append(a - p)
    return sorted((r, tuple(dys)) for r, dys in groups.items())


# Depends only on the fixed morphology kernels (not on H, W) -> import-time.
TERMS = {
    "disk10": _decompose(DISK10),   # 7 half-widths, 6 matmuls, 20 shifts
    "disk1": _decompose(DISK1),     # 2 half-widths, 1 matmul,  2 shifts
    "ones15": _decompose(ONES15),   # 1 half-width,  1 matmul, 14 shifts
}


# --------------------------------- kernel ------------------------------------
def _make_kernel(H, W, use_blacklist, fetch_explored, merged_pair):
    t_disk10 = TERMS["disk10"]
    t_disk1 = TERMS["disk1"]
    t_ones15 = TERMS["ones15"]

    def kernel(*refs):
        it = iter(refs)
        _ = next(it)                        # scalar-prefetch ref (used by index_maps)
        cat_ref = next(it)
        if merged_pair:                     # [BEEN_CLOSE, BLACKLIST] in one DMA
            pair_ref = next(it)
            mask0 = pair_ref[0, 0]
            black = pair_ref[0, 1]
        else:
            mask0 = next(it)[0, 0]
            black = next(it)[0, 0] if use_blacklist else None
        expl = next(it)[0, 0] if fetch_explored else mask0
        goal_ref = next(it)
        found_ref = next(it)

        # Hoisted iotas (built once per grid step, reused by every term).
        rows = jax.lax.broadcasted_iota(jnp.int32, (H, W), 0)
        ci = jax.lax.broadcasted_iota(jnp.int32, (W, W), 0)
        cj = jax.lax.broadcasted_iota(jnp.int32, (W, W), 1)
        col_d = jnp.abs(ci - cj)            # |i - j| for in-register band build

        def vshift_add(acc, y, dy):
            """acc + Z with Z[v, :] = y[v + dy, :] (zero outside [0, H))."""
            if dy == 0:
                return acc + y
            rolled = pltpu.roll(y, (-dy) % H, 0)          # XLU sublane rotate
            valid = (rows < (H - dy)) if dy > 0 else (rows >= (-dy))
            return acc + jnp.where(valid, rolled, 0.0)

        def conv(x_f32, x_b16, term_list):
            """Exact 'same'-padded conv with a 0/1 kernel whose rows are
            centered runs: one MXU matmul per distinct half-width against an
            in-register (W, W) band (horizontal box; zero padding for free),
            then sublane shift-adds for the vertical part.  f32 accumulation."""
            acc = jnp.zeros((H, W), jnp.float32)
            for r, dys in term_list:
                if r == 0:                  # width-1 horizontal box == identity
                    hbox = x_f32
                else:
                    band = (col_d <= r).astype(jnp.bfloat16)
                    hbox = jnp.dot(x_b16, band,
                                   preferred_element_type=jnp.float32)
                for dy in dys:
                    acc = vshift_add(acc, hbox, dy)
            return acc

        # ---- reach_goal_if_present --------------------------------------
        cat_feat = cat_ref[0, 0]
        if use_blacklist:
            cat_feat = cat_feat * (1.0 - black)
        # Exact float equality matches the reference (channels are binary).
        goal_reach = (cat_feat == 1.0).astype(jnp.float32)
        found_k = jnp.max(goal_reach, axis=(0, 1), keepdims=True)   # (1, 1)

        # ---- get_frontier --------------------------------------------------
        # binary_dilation(x, k) := clamp(conv2d(x, k, 'same'), 0, 1)
        nm_f = (mask0 != 0.0).astype(jnp.float32)        # 1 - mask
        nm_b = nm_f.astype(jnp.bfloat16)
        dil = jnp.minimum(conv(nm_f, nm_b, t_disk10), 1.0)
        dig = 1.0 - dil                                  # 0/1, exact in f32
        border = jnp.minimum(conv(dig, dig.astype(jnp.bfloat16), t_disk1),
                             1.0) - dig
        if fetch_explored:
            unk_f = (expl == 0.0).astype(jnp.float32)
        else:
            unk_f = 1.0 - nm_f          # strategy == 'seen_frontier': same channel
        gain = conv(unk_f, unk_f.astype(jnp.bfloat16), t_ones15)
        weighted = border * gain                         # integer-exact f32

        # ---- explore_if_missing -------------------------------------------
        explore_mask = (weighted > 0.5).astype(jnp.float32)
        goal = jnp.where(found_k > 0.0, goal_reach, explore_mask)

        goal_ref[...] = goal.astype(jnp.bfloat16)[None]  # exact 0/1 -> bf16
        found_ref[...] = found_k[None]

    return kernel


# -------------------------------- wrapper ------------------------------------
def reach_then_explore(features, category, visited_mask=None,
                       strategy="seen_frontier"):
    """Pallas implementation of FrontierExplorer.reach_then_explore."""
    assert strategy in ("seen_frontier", "been_close_to_frontier")
    B, C, H, W = features.shape
    use_blacklist = visited_mask is not None
    mask_ch = EXPLORED_MAP if strategy == "seen_frontier" else BEEN_CLOSE_MAP
    fetch_explored = mask_ch != EXPLORED_MAP
    # BEEN_CLOSE (4) and BLACKLIST (5) are adjacent & 2-aligned: one DMA.
    merged_pair = (fetch_explored and use_blacklist
                   and BLACKLISTED_TARGETS_MAP == BEEN_CLOSE_MAP + 1
                   and BEEN_CLOSE_MAP % 2 == 0)

    cat_spec = pl.BlockSpec(
        (1, 1, H, W), lambda i, cat: (i, cat[i] + 2 * NON_SEM_CHANNELS, 0, 0))
    in_specs = [cat_spec]
    args = [features]
    if merged_pair:
        in_specs.append(pl.BlockSpec(
            (1, 2, H, W), lambda i, cat: (i, BEEN_CLOSE_MAP // 2, 0, 0)))
        args.append(features)
    else:
        in_specs.append(pl.BlockSpec(
            (1, 1, H, W), lambda i, cat: (i, mask_ch, 0, 0)))
        args.append(features)
        if use_blacklist:
            in_specs.append(pl.BlockSpec(
                (1, 1, H, W), lambda i, cat: (i, BLACKLISTED_TARGETS_MAP, 0, 0)))
            args.append(features)
    if fetch_explored:
        in_specs.append(pl.BlockSpec(
            (1, 1, H, W), lambda i, cat: (i, EXPLORED_MAP, 0, 0)))
        args.append(features)

    goal_spec = pl.BlockSpec((1, H, W), lambda i, cat: (i, 0, 0))
    found_spec = pl.BlockSpec((1, 1, 1), lambda i, cat: (i, 0, 0))

    # VMEM budget sized from the working set (double-buffered channel inputs,
    # bf16 goal output, f32 temporaries), floored at v5e's 16 MiB default.
    n_chan = 1 + (2 if merged_pair else 1 + int(use_blacklist)) + int(fetch_explored)
    est = 2 * n_chan * H * W * 4          # double-buffered f32 channel blocks
    est += 2 * (H * W * 2 + 4096)         # double-buffered outputs
    est += 16 * H * W * 4                 # live f32 temporaries in the body
    est += 2 * W * W * 4                  # iota / band temporaries
    vmem_limit = int(min(max(est + (4 << 20), 16 << 20), 120 << 20))

    goal_b16, found_raw = pl.pallas_call(
        _make_kernel(H, W, use_blacklist, fetch_explored, merged_pair),
        out_shape=(jax.ShapeDtypeStruct((B, H, W), jnp.bfloat16),
                   jax.ShapeDtypeStruct((B, 1, 1), jnp.float32)),
        grid_spec=pltpu.PrefetchScalarGridSpec(
            num_scalar_prefetch=1,
            grid=(B,),
            in_specs=in_specs,
            out_specs=[goal_spec, found_spec]),
        compiler_params=pltpu.CompilerParams(
            dimension_semantics=("parallel",),
            vmem_limit_bytes=vmem_limit),
    )(category.astype(jnp.int32), *args)

    return goal_b16.astype(jnp.float32), found_raw[:, 0, 0] > 0.5


# --------------------------- pure-JAX reference ------------------------------
def _conv2d_ref(x, k):
    K = k.shape[0]
    y = jax.lax.conv_general_dilated(
        x[:, None], jnp.asarray(k)[None, None], (1, 1),
        [(K // 2, K // 2), (K // 2, K // 2)],
        dimension_numbers=("NCHW", "OIHW", "NCHW"),
        precision=jax.lax.Precision.HIGHEST)
    return y[:, 0]


def reach_then_explore_ref(features, category, visited_mask=None,
                           strategy="seen_frontier"):
    B = features.shape[0]
    idx = category + 2 * NON_SEM_CHANNELS
    cat_feat = features[jnp.arange(B), idx]
    if visited_mask is not None:
        cat_feat = cat_feat * (1.0 - features[:, BLACKLISTED_TARGETS_MAP])
    goal_reach = (cat_feat == 1.0).astype(jnp.float32)
    found = jnp.any(goal_reach > 0, axis=(1, 2))

    mask_ch = EXPLORED_MAP if strategy == "seen_frontier" else BEEN_CLOSE_MAP
    mask = (features[:, mask_ch] == 0.0).astype(jnp.float32)
    dig = 1.0 - jnp.clip(_conv2d_ref(1.0 - mask, DISK10), 0.0, 1.0)
    border = jnp.clip(_conv2d_ref(dig, DISK1), 0.0, 1.0) - dig
    unk = (features[:, EXPLORED_MAP] == 0.0).astype(jnp.float32)
    gain = _conv2d_ref(unk, ONES15)
    weighted = border * gain
    explore_mask = (weighted > 0.5).astype(jnp.float32)
    goal = jnp.where(found[:, None, None], goal_reach, explore_mask)
    return goal, found


if __name__ == "__main__":
    key = jax.random.PRNGKey(0)
    B, H, W = 2, 16, 16
    num_sem = 4
    C = 2 * NON_SEM_CHANNELS + num_sem                  # 16 channels

    k1, _ = jax.random.split(key)
    features = jax.random.bernoulli(k1, 0.3, (B, C, H, W)).astype(jnp.float32)
    category = jnp.array([0, 2], dtype=jnp.int32)
    # Make batch 1's target category absent so it exercises the frontier branch.
    features = features.at[1, 2 + 2 * NON_SEM_CHANNELS].set(0.0)
    # Non-None visited_mask just enables blacklist masking (values unused).
    visited_mask = jnp.ones((B, H, W), jnp.float32)

    cases = [
        ("seen_frontier", visited_mask),            # blacklist, single-channel DMAs
        ("been_close_to_frontier", None),           # separate explored fetch
        ("been_close_to_frontier", visited_mask),   # merged 2-channel DMA path
    ]
    for strategy, vm in cases:
        goal, found = reach_then_explore(features, category, vm, strategy=strategy)
        jax.block_until_ready((goal, found))
        goal_r, found_r = reach_then_explore_ref(features, category, vm,
                                                 strategy=strategy)
        np.testing.assert_array_equal(np.asarray(goal), np.asarray(goal_r))
        np.testing.assert_array_equal(np.asarray(found), np.asarray(found_r))

    print("KERNEL_OK")
</pallas_src>

<mosaic_0001>
module attributes {stable_mosaic.version = 11 : i64} {
  func.func @kernel(%arg0: i32, %arg1: memref<2xi32, #tpu.memory_space<smem>>, %arg2: memref<1x1x16x16xf32, #tpu.memory_space<vmem>>, %arg3: memref<1x1x16x16xf32, #tpu.memory_space<vmem>>, %arg4: memref<1x1x16x16xf32, #tpu.memory_space<vmem>>, %arg5: memref<1x16x16xbf16, #tpu.memory_space<vmem>>, %arg6: memref<1x1x1xf32, #tpu.memory_space<vmem>>) attributes {dimension_semantics = [#tpu.dimension_semantics<parallel>], iteration_bounds = array<i64: 2>, scalar_prefetch = 1 : i64, scratch_operands = 0 : i64, tpu.core_type = #tpu.core_type<tc>, window_params = [{transform_indices = @transform_0, window_bounds = array<i64: 1, 1, 16, 16>}, {transform_indices = @transform_1, window_bounds = array<i64: 1, 1, 16, 16>}, {transform_indices = @transform_2, window_bounds = array<i64: 1, 1, 16, 16>}, {transform_indices = @transform_3, window_bounds = array<i64: 1, 16, 16>}, {transform_indices = @transform_4, window_bounds = array<i64: 1, 1, 1>}]} {
    %c0 = arith.constant 0 : index
    %c0_0 = arith.constant 0 : index
    %c0_1 = arith.constant 0 : index
    %c0_2 = arith.constant 0 : index
    %0 = vector.load %arg3[%c0, %c0_0, %c0_1, %c0_2] : memref<1x1x16x16xf32, #tpu.memory_space<vmem>>, vector<1x1x16x16xf32>
    %1 = vector.shape_cast %0 : vector<1x1x16x16xf32> to vector<16x16xf32>
    %c0_3 = arith.constant 0 : index
    %c0_4 = arith.constant 0 : index
    %c0_5 = arith.constant 0 : index
    %c0_6 = arith.constant 0 : index
    %2 = vector.load %arg4[%c0_3, %c0_4, %c0_5, %c0_6] : memref<1x1x16x16xf32, #tpu.memory_space<vmem>>, vector<1x1x16x16xf32>
    %3 = vector.shape_cast %2 : vector<1x1x16x16xf32> to vector<16x16xf32>
    %4 = tpu.iota {dimensions = array<i32: 0>} : vector<16x16xi32>
    %5 = tpu.iota {dimensions = array<i32: 0>} : vector<16x16xi32>
    %6 = tpu.iota {dimensions = array<i32: 1>} : vector<16x16xi32>
    %7 = arith.subi %5, %6 : vector<16x16xi32>
    %8 = math.absi %7 : vector<16x16xi32>
    %c0_7 = arith.constant 0 : index
    %c0_8 = arith.constant 0 : index
    %c0_9 = arith.constant 0 : index
    %c0_10 = arith.constant 0 : index
    %9 = vector.load %arg2[%c0_7, %c0_8, %c0_9, %c0_10] : memref<1x1x16x16xf32, #tpu.memory_space<vmem>>, vector<1x1x16x16xf32>
    %10 = vector.shape_cast %9 : vector<1x1x16x16xf32> to vector<16x16xf32>
    %cst = arith.constant 1.000000e+00 : f32
    %11 = vector.broadcast %cst : f32 to vector<16x16xf32>
    %12 = arith.subf %11, %3 : vector<16x16xf32>
    %13 = arith.mulf %10, %12 : vector<16x16xf32>
    %cst_11 = arith.constant 1.000000e+00 : f32
    %14 = vector.broadcast %cst_11 : f32 to vector<16x16xf32>
    %15 = arith.cmpf oeq, %13, %14 : vector<16x16xf32>
    %16 = arith.extui %15 : vector<16x16xi1> to vector<16x16xi32>
    %17 = arith.sitofp %16 : vector<16x16xi32> to vector<16x16xf32>
    %18 = vector.shape_cast %17 : vector<16x16xf32> to vector<1x16x16xf32>
    %cst_12 = arith.constant dense<0xFF800000> : vector<1xf32>
    %19 = vector.multi_reduction <maximumf>, %18, %cst_12 [1, 2] : vector<1x16x16xf32> to vector<1xf32>
    %20 = vector.shape_cast %19 : vector<1xf32> to vector<1x1x1xf32>
    %21 = vector.extract %20[0, 0, 0] : f32 from vector<1x1x1xf32>
    %22 = vector.broadcast %21 : f32 to vector<1x1xf32>
    %cst_13 = arith.constant 0.000000e+00 : f32
    %23 = vector.broadcast %cst_13 : f32 to vector<16x16xf32>
    %24 = arith.cmpf one, %1, %23 : vector<16x16xf32>
    %25 = arith.extui %24 : vector<16x16xi1> to vector<16x16xi32>
    %26 = arith.sitofp %25 : vector<16x16xi32> to vector<16x16xf32>
    %27 = arith.truncf %26 : vector<16x16xf32> to vector<16x16xbf16>
    %cst_14 = arith.constant 0.000000e+00 : f32
    %28 = vector.broadcast %cst_14 : f32 to vector<16x16xf32>
    %c10_i32 = arith.constant 10 : i32
    %29 = tpu.dynamic_rotate %26 by %c10_i32 dim 0 : vector<16x16xf32>, i32 -> vector<16x16xf32>
    %c10_i32_15 = arith.constant 10 : i32
    %30 = vector.broadcast %c10_i32_15 : i32 to vector<16x16xi32>
    %31 = arith.cmpi sge, %4, %30 : vector<16x16xi32>
    %cst_16 = arith.constant 0.000000e+00 : f32
    %32 = vector.broadcast %cst_16 : f32 to vector<16x16xf32>
    %33 = arith.select %31, %29, %32 : vector<16x16xi1>, vector<16x16xf32>
    %34 = arith.addf %28, %33 : vector<16x16xf32>
    %c6_i32 = arith.constant 6 : i32
    %35 = tpu.dynamic_rotate %26 by %c6_i32 dim 0 : vector<16x16xf32>, i32 -> vector<16x16xf32>
    %c6_i32_17 = arith.constant 6 : i32
    %36 = vector.broadcast %c6_i32_17 : i32 to vector<16x16xi32>
    %37 = arith.cmpi slt, %4, %36 : vector<16x16xi32>
    %cst_18 = arith.constant 0.000000e+00 : f32
    %38 = vector.broadcast %cst_18 : f32 to vector<16x16xf32>
    %39 = arith.select %37, %35, %38 : vector<16x16xi1>, vector<16x16xf32>
    %40 = arith.addf %34, %39 : vector<16x16xf32>
    %c4_i32 = arith.constant 4 : i32
    %41 = vector.broadcast %c4_i32 : i32 to vector<16x16xi32>
    %42 = arith.cmpi sle, %8, %41 : vector<16x16xi32>
    %43 = arith.extui %42 : vector<16x16xi1> to vector<16x16xi32>
    %44 = arith.sitofp %43 : vector<16x16xi32> to vector<16x16xf32>
    %45 = arith.truncf %44 : vector<16x16xf32> to vector<16x16xbf16>
    %cst_19 = arith.constant dense<0.000000e+00> : vector<16x16xf32>
    %46 = tpu.matmul %27, %45, %cst_19 {dimension_numbers = #tpu.dot_dimension_numbers<[1], [0], [0], [1], [0, 0, 1, 1], [], []>} : vector<16x16xbf16>, vector<16x16xbf16>, vector<16x16xf32> -> vector<16x16xf32>
    %c9_i32 = arith.constant 9 : i32
    %47 = tpu.dynamic_rotate %46 by %c9_i32 dim 0 : vector<16x16xf32>, i32 -> vector<16x16xf32>
    %c9_i32_20 = arith.constant 9 : i32
    %48 = vector.broadcast %c9_i32_20 : i32 to vector<16x16xi32>
    %49 = arith.cmpi sge, %4, %48 : vector<16x16xi32>
    %cst_21 = arith.constant 0.000000e+00 : f32
    %50 = vector.broadcast %cst_21 : f32 to vector<16x16xf32>
    %51 = arith.select %49, %47, %50 : vector<16x16xi1>, vector<16x16xf32>
    %52 = arith.addf %40, %51 : vector<16x16xf32>
    %c7_i32 = arith.constant 7 : i32
    %53 = tpu.dynamic_rotate %46 by %c7_i32 dim 0 : vector<16x16xf32>, i32 -> vector<16x16xf32>
    %c7_i32_22 = arith.constant 7 : i32
    %54 = vector.broadcast %c7_i32_22 : i32 to vector<16x16xi32>
    %55 = arith.cmpi slt, %4, %54 : vector<16x16xi32>
    %cst_23 = arith.constant 0.000000e+00 : f32
    %56 = vector.broadcast %cst_23 : f32 to vector<16x16xf32>
    %57 = arith.select %55, %53, %56 : vector<16x16xi1>, vector<16x16xf32>
    %58 = arith.addf %52, %57 : vector<16x16xf32>
    %c6_i32_24 = arith.constant 6 : i32
    %59 = vector.broadcast %c6_i32_24 : i32 to vector<16x16xi32>
    %60 = arith.cmpi sle, %8, %59 : vector<16x16xi32>
    %61 = arith.extui %60 : vector<16x16xi1> to vector<16x16xi32>
    %62 = arith.sitofp %61 : vector<16x16xi32> to vector<16x16xf32>
    %63 = arith.truncf %62 : vector<16x16xf32> to vector<16x16xbf16>
    %cst_25 = arith.constant dense<0.000000e+00> : vector<16x16xf32>
    %64 = tpu.matmul %27, %63, %cst_25 {dimension_numbers = #tpu.dot_dimension_numbers<[1], [0], [0], [1], [0, 0, 1, 1], [], []>} : vector<16x16xbf16>, vector<16x16xbf16>, vector<16x16xf32> -> vector<16x16xf32>
    %c8_i32 = arith.constant 8 : i32
    %65 = tpu.dynamic_rotate %64 by %c8_i32 dim 0 : vector<16x16xf32>, i32 -> vector<16x16xf32>
    %c8_i32_26 = arith.constant 8 : i32
    %66 = vector.broadcast %c8_i32_26 : i32 to vector<16x16xi32>
    %67 = arith.cmpi sge, %4, %66 : vector<16x16xi32>
    %cst_27 = arith.constant 0.000000e+00 : f32
    %68 = vector.broadcast %cst_27 : f32 to vector<16x16xf32>
    %69 = arith.select %67, %65, %68 : vector<16x16xi1>, vector<16x16xf32>
    %70 = arith.addf %58, %69 : vector<16x16xf32>
    %c8_i32_28 = arith.constant 8 : i32
    %71 = tpu.dynamic_rotate %64 by %c8_i32_28 dim 0 : vector<16x16xf32>, i32 -> vector<16x16xf32>
    %c8_i32_29 = arith.constant 8 : i32
    %72 = vector.broadcast %c8_i32_29 : i32 to vector<16x16xi32>
    %73 = arith.cmpi slt, %4, %72 : vector<16x16xi32>
    %cst_30 = arith.constant 0.000000e+00 : f32
    %74 = vector.broadcast %cst_30 : f32 to vector<16x16xf32>
    %75 = arith.select %73, %71, %74 : vector<16x16xi1>, vector<16x16xf32>
    %76 = arith.addf %70, %75 : vector<16x16xf32>
    %c7_i32_31 = arith.constant 7 : i32
    %77 = vector.broadcast %c7_i32_31 : i32 to vector<16x16xi32>
    %78 = arith.cmpi sle, %8, %77 : vector<16x16xi32>
    %79 = arith.extui %78 : vector<16x16xi1> to vector<16x16xi32>
    %80 = arith.sitofp %79 : vector<16x16xi32> to vector<16x16xf32>
    %81 = arith.truncf %80 : vector<16x16xf32> to vector<16x16xbf16>
    %cst_32 = arith.constant dense<0.000000e+00> : vector<16x16xf32>
    %82 = tpu.matmul %27, %81, %cst_32 {dimension_numbers = #tpu.dot_dimension_numbers<[1], [0], [0], [1], [0, 0, 1, 1], [], []>} : vector<16x16xbf16>, vector<16x16xbf16>, vector<16x16xf32> -> vector<16x16xf32>
    %c7_i32_33 = arith.constant 7 : i32
    %83 = tpu.dynamic_rotate %82 by %c7_i32_33 dim 0 : vector<16x16xf32>, i32 -> vector<16x16xf32>
    %c7_i32_34 = arith.constant 7 : i32
    %84 = vector.broadcast %c7_i32_34 : i32 to vector<16x16xi32>
    %85 = arith.cmpi sge, %4, %84 : vector<16x16xi32>
    %cst_35 = arith.constant 0.000000e+00 : f32
    %86 = vector.broadcast %cst_35 : f32 to vector<16x16xf32>
    %87 = arith.select %85, %83, %86 : vector<16x16xi1>, vector<16x16xf32>
    %88 = arith.addf %76, %87 : vector<16x16xf32>
    %c9_i32_36 = arith.constant 9 : i32
    %89 = tpu.dynamic_rotate %82 by %c9_i32_36 dim 0 : vector<16x16xf32>, i32 -> vector<16x16xf32>
    %c9_i32_37 = arith.constant 9 : i32
    %90 = vector.broadcast %c9_i32_37 : i32 to vector<16x16xi32>
    %91 = arith.cmpi slt, %4, %90 : vector<16x16xi32>
    %cst_38 = arith.constant 0.000000e+00 : f32
    %92 = vector.broadcast %cst_38 : f32 to vector<16x16xf32>
    %93 = arith.select %91, %89, %92 : vector<16x16xi1>, vector<16x16xf32>
    %94 = arith.addf %88, %93 : vector<16x16xf32>
    %c8_i32_39 = arith.constant 8 : i32
    %95 = vector.broadcast %c8_i32_39 : i32 to vector<16x16xi32>
    %96 = arith.cmpi sle, %8, %95 : vector<16x16xi32>
    %97 = arith.extui %96 : vector<16x16xi1> to vector<16x16xi32>
    %98 = arith.sitofp %97 : vector<16x16xi32> to vector<16x16xf32>
    %99 = arith.truncf %98 : vector<16x16xf32> to vector<16x16xbf16>
    %cst_40 = arith.constant dense<0.000000e+00> : vector<16x16xf32>
    %100 = tpu.matmul %27, %99, %cst_40 {dimension_numbers = #tpu.dot_dimension_numbers<[1], [0], [0], [1], [0, 0, 1, 1], [], []>} : vector<16x16xbf16>, vector<16x16xbf16>, vector<16x16xf32> -> vector<16x16xf32>
    %c6_i32_41 = arith.constant 6 : i32
    %101 = tpu.dynamic_rotate %100 by %c6_i32_41 dim 0 : vector<16x16xf32>, i32 -> vector<16x16xf32>
    %c6_i32_42 = arith.constant 6 : i32
    %102 = vector.broadcast %c6_i32_42 : i32 to vector<16x16xi32>
    %103 = arith.cmpi sge, %4, %102 : vector<16x16xi32>
    %cst_43 = arith.constant 0.000000e+00 : f32
    %104 = vector.broadcast %cst_43 : f32 to vector<16x16xf32>
    %105 = arith.select %103, %101, %104 : vector<16x16xi1>, vector<16x16xf32>
    %106 = arith.addf %94, %105 : vector<16x16xf32>
    %c5_i32 = arith.constant 5 : i32
    %107 = tpu.dynamic_rotate %100 by %c5_i32 dim 0 : vector<16x16xf32>, i32 -> vector<16x16xf32>
    %c5_i32_44 = arith.constant 5 : i32
    %108 = vector.broadcast %c5_i32_44 : i32 to vector<16x16xi32>
    %109 = arith.cmpi sge, %4, %108 : vector<16x16xi32>
    %cst_45 = arith.constant 0.000000e+00 : f32
    %110 = vector.broadcast %cst_45 : f32 to vector<16x16xf32>
    %111 = arith.select %109, %107, %110 : vector<16x16xi1>, vector<16x16xf32>
    %112 = arith.addf %106, %111 : vector<16x16xf32>
    %c11_i32 = arith.constant 11 : i32
    %113 = tpu.dynamic_rotate %100 by %c11_i32 dim 0 : vector<16x16xf32>, i32 -> vector<16x16xf32>
    %c11_i32_46 = arith.constant 11 : i32
    %114 = vector.broadcast %c11_i32_46 : i32 to vector<16x16xi32>
    %115 = arith.cmpi slt, %4, %114 : vector<16x16xi32>
    %cst_47 = arith.constant 0.000000e+00 : f32
    %116 = vector.broadcast %cst_47 : f32 to vector<16x16xf32>
    %117 = arith.select %115, %113, %116 : vector<16x16xi1>, vector<16x16xf32>
    %118 = arith.addf %112, %117 : vector<16x16xf32>
    %c10_i32_48 = arith.constant 10 : i32
    %119 = tpu.dynamic_rotate %100 by %c10_i32_48 dim 0 : vector<16x16xf32>, i32 -> vector<16x16xf32>
    %c10_i32_49 = arith.constant 10 : i32
    %120 = vector.broadcast %c10_i32_49 : i32 to vector<16x16xi32>
    %121 = arith.cmpi slt, %4, %120 : vector<16x16xi32>
    %cst_50 = arith.constant 0.000000e+00 : f32
    %122 = vector.broadcast %cst_50 : f32 to vector<16x16xf32>
    %123 = arith.select %121, %119, %122 : vector<16x16xi1>, vector<16x16xf32>
    %124 = arith.addf %118, %123 : vector<16x16xf32>
    %c9_i32_51 = arith.constant 9 : i32
    %125 = vector.broadcast %c9_i32_51 : i32 to vector<16x16xi32>
    %126 = arith.cmpi sle, %8, %125 : vector<16x16xi32>
    %127 = arith.extui %126 : vector<16x16xi1> to vector<16x16xi32>
    %128 = arith.sitofp %127 : vector<16x16xi32> to vector<16x16xf32>
    %129 = arith.truncf %128 : vector<16x16xf32> to vector<16x16xbf16>
    %cst_52 = arith.constant dense<0.000000e+00> : vector<16x16xf32>
    %130 = tpu.matmul %27, %129, %cst_52 {dimension_numbers = #tpu.dot_dimension_numbers<[1], [0], [0], [1], [0, 0, 1, 1], [], []>} : vector<16x16xbf16>, vector<16x16xbf16>, vector<16x16xf32> -> vector<16x16xf32>
    %c4_i32_53 = arith.constant 4 : i32
    %131 = tpu.dynamic_rotate %130 by %c4_i32_53 dim 0 : vector<16x16xf32>, i32 -> vector<16x16xf32>
    %c4_i32_54 = arith.constant 4 : i32
    %132 = vector.broadcast %c4_i32_54 : i32 to vector<16x16xi32>
    %133 = arith.cmpi sge, %4, %132 : vector<16x16xi32>
    %cst_55 = arith.constant 0.000000e+00 : f32
    %134 = vector.broadcast %cst_55 : f32 to vector<16x16xf32>
    %135 = arith.select %133, %131, %134 : vector<16x16xi1>, vector<16x16xf32>
    %136 = arith.addf %124, %135 : vector<16x16xf32>
    %c3_i32 = arith.constant 3 : i32
    %137 = tpu.dynamic_rotate %130 by %c3_i32 dim 0 : vector<16x16xf32>, i32 -> vector<16x16xf32>
    %c3_i32_56 = arith.constant 3 : i32
    %138 = vector.broadcast %c3_i32_56 : i32 to vector<16x16xi32>
    %139 = arith.cmpi sge, %4, %138 : vector<16x16xi32>
    %cst_57 = arith.constant 0.000000e+00 : f32
    %140 = vector.broadcast %cst_57 : f32 to vector<16x16xf32>
    %141 = arith.select %139, %137, %140 : vector<16x16xi1>, vector<16x16xf32>
    %142 = arith.addf %136, %141 : vector<16x16xf32>
    %c2_i32 = arith.constant 2 : i32
    %143 = tpu.dynamic_rotate %130 by %c2_i32 dim 0 : vector<16x16xf32>, i32 -> vector<16x16xf32>
    %c2_i32_58 = arith.constant 2 : i32
    %144 = vector.broadcast %c2_i32_58 : i32 to vector<16x16xi32>
    %145 = arith.cmpi sge, %4, %144 : vector<16x16xi32>
    %cst_59 = arith.constant 0.000000e+00 : f32
    %146 = vector.broadcast %cst_59 : f32 to vector<16x16xf32>
    %147 = arith.select %145, %143, %146 : vector<16x16xi1>, vector<16x16xf32>
    %148 = arith.addf %142, %147 : vector<16x16xf32>
    %c1_i32 = arith.constant 1 : i32
    %149 = tpu.dynamic_rotate %130 by %c1_i32 dim 0 : vector<16x16xf32>, i32 -> vector<16x16xf32>
    %c1_i32_60 = arith.constant 1 : i32
    %150 = vector.broadcast %c1_i32_60 : i32 to vector<16x16xi32>
    %151 = arith.cmpi sge, %4, %150 : vector<16x16xi32>
    %cst_61 = arith.constant 0.000000e+00 : f32
    %152 = vector.broadcast %cst_61 : f32 to vector<16x16xf32>
    %153 = arith.select %151, %149, %152 : vector<16x16xi1>, vector<16x16xf32>
    %154 = arith.addf %148, %153 : vector<16x16xf32>
    %c15_i32 = arith.constant 15 : i32
    %155 = tpu.dynamic_rotate %130 by %c15_i32 dim 0 : vector<16x16xf32>, i32 -> vector<16x16xf32>
    %c15_i32_62 = arith.constant 15 : i32
    %156 = vector.broadcast %c15_i32_62 : i32 to vector<16x16xi32>
    %157 = arith.cmpi slt, %4, %156 : vector<16x16xi32>
    %cst_63 = arith.constant 0.000000e+00 : f32
    %158 = vector.broadcast %cst_63 : f32 to vector<16x16xf32>
    %159 = arith.select %157, %155, %158 : vector<16x16xi1>, vector<16x16xf32>
    %160 = arith.addf %154, %159 : vector<16x16xf32>
    %c14_i32 = arith.constant 14 : i32
    %161 = tpu.dynamic_rotate %130 by %c14_i32 dim 0 : vector<16x16xf32>, i32 -> vector<16x16xf32>
    %c14_i32_64 = arith.constant 14 : i32
    %162 = vector.broadcast %c14_i32_64 : i32 to vector<16x16xi32>
    %163 = arith.cmpi slt, %4, %162 : vector<16x16xi32>
    %cst_65 = arith.constant 0.000000e+00 : f32
    %164 = vector.broadcast %cst_65 : f32 to vector<16x16xf32>
    %165 = arith.select %163, %161, %164 : vector<16x16xi1>, vector<16x16xf32>
    %166 = arith.addf %160, %165 : vector<16x16xf32>
    %c13_i32 = arith.constant 13 : i32
    %167 = tpu.dynamic_rotate %130 by %c13_i32 dim 0 : vector<16x16xf32>, i32 -> vector<16x16xf32>
    %c13_i32_66 = arith.constant 13 : i32
    %168 = vector.broadcast %c13_i32_66 : i32 to vector<16x16xi32>
    %169 = arith.cmpi slt, %4, %168 : vector<16x16xi32>
    %cst_67 = arith.constant 0.000000e+00 : f32
    %170 = vector.broadcast %cst_67 : f32 to vector<16x16xf32>
    %171 = arith.select %169, %167, %170 : vector<16x16xi1>, vector<16x16xf32>
    %172 = arith.addf %166, %171 : vector<16x16xf32>
    %c12_i32 = arith.constant 12 : i32
    %173 = tpu.dynamic_rotate %130 by %c12_i32 dim 0 : vector<16x16xf32>, i32 -> vector<16x16xf32>
    %c12_i32_68 = arith.constant 12 : i32
    %174 = vector.broadcast %c12_i32_68 : i32 to vector<16x16xi32>
    %175 = arith.cmpi slt, %4, %174 : vector<16x16xi32>
    %cst_69 = arith.constant 0.000000e+00 : f32
    %176 = vector.broadcast %cst_69 : f32 to vector<16x16xf32>
    %177 = arith.select %175, %173, %176 : vector<16x16xi1>, vector<16x16xf32>
    %178 = arith.addf %172, %177 : vector<16x16xf32>
    %c10_i32_70 = arith.constant 10 : i32
    %179 = vector.broadcast %c10_i32_70 : i32 to vector<16x16xi32>
    %180 = arith.cmpi sle, %8, %179 : vector<16x16xi32>
    %181 = arith.extui %180 : vector<16x16xi1> to vector<16x16xi32>
    %182 = arith.sitofp %181 : vector<16x16xi32> to vector<16x16xf32>
    %183 = arith.truncf %182 : vector<16x16xf32> to vector<16x16xbf16>
    %cst_71 = arith.constant dense<0.000000e+00> : vector<16x16xf32>
    %184 = tpu.matmul %27, %183, %cst_71 {dimension_numbers = #tpu.dot_dimension_numbers<[1], [0], [0], [1], [0, 0, 1, 1], [], []>} : vector<16x16xbf16>, vector<16x16xbf16>, vector<16x16xf32> -> vector<16x16xf32>
    %185 = arith.addf %178, %184 : vector<16x16xf32>
    %cst_72 = arith.constant 1.000000e+00 : f32
    %186 = vector.broadcast %cst_72 : f32 to vector<16x16xf32>
    %187 = arith.minimumf %185, %186 : vector<16x16xf32>
    %cst_73 = arith.constant 1.000000e+00 : f32
    %188 = vector.broadcast %cst_73 : f32 to vector<16x16xf32>
    %189 = arith.subf %188, %187 : vector<16x16xf32>
    %190 = arith.truncf %189 : vector<16x16xf32> to vector<16x16xbf16>
    %cst_74 = arith.constant 0.000000e+00 : f32
    %191 = vector.broadcast %cst_74 : f32 to vector<16x16xf32>
    %c1_i32_75 = arith.constant 1 : i32
    %192 = tpu.dynamic_rotate %189 by %c1_i32_75 dim 0 : vector<16x16xf32>, i32 -> vector<16x16xf32>
    %c1_i32_76 = arith.constant 1 : i32
    %193 = vector.broadcast %c1_i32_76 : i32 to vector<16x16xi32>
    %194 = arith.cmpi sge, %4, %193 : vector<16x16xi32>
    %cst_77 = arith.constant 0.000000e+00 : f32
    %195 = vector.broadcast %cst_77 : f32 to vector<16x16xf32>
    %196 = arith.select %194, %192, %195 : vector<16x16xi1>, vector<16x16xf32>
    %197 = arith.addf %191, %196 : vector<16x16xf32>
    %c15_i32_78 = arith.constant 15 : i32
    %198 = tpu.dynamic_rotate %189 by %c15_i32_78 dim 0 : vector<16x16xf32>, i32 -> vector<16x16xf32>
    %c15_i32_79 = arith.constant 15 : i32
    %199 = vector.broadcast %c15_i32_79 : i32 to vector<16x16xi32>
    %200 = arith.cmpi slt, %4, %199 : vector<16x16xi32>
    %cst_80 = arith.constant 0.000000e+00 : f32
    %201 = vector.broadcast %cst_80 : f32 to vector<16x16xf32>
    %202 = arith.select %200, %198, %201 : vector<16x16xi1>, vector<16x16xf32>
    %203 = arith.addf %197, %202 : vector<16x16xf32>
    %c1_i32_81 = arith.constant 1 : i32
    %204 = vector.broadcast %c1_i32_81 : i32 to vector<16x16xi32>
    %205 = arith.cmpi sle, %8, %204 : vector<16x16xi32>
    %206 = arith.extui %205 : vector<16x16xi1> to vector<16x16xi32>
    %207 = arith.sitofp %206 : vector<16x16xi32> to vector<16x16xf32>
    %208 = arith.truncf %207 : vector<16x16xf32> to vector<16x16xbf16>
    %cst_82 = arith.constant dense<0.000000e+00> : vector<16x16xf32>
    %209 = tpu.matmul %190, %208, %cst_82 {dimension_numbers = #tpu.dot_dimension_numbers<[1], [0], [0], [1], [0, 0, 1, 1], [], []>} : vector<16x16xbf16>, vector<16x16xbf16>, vector<16x16xf32> -> vector<16x16xf32>
    %210 = arith.addf %203, %209 : vector<16x16xf32>
    %cst_83 = arith.constant 1.000000e+00 : f32
    %211 = vector.broadcast %cst_83 : f32 to vector<16x16xf32>
    %212 = arith.minimumf %210, %211 : vector<16x16xf32>
    %213 = arith.subf %212, %189 : vector<16x16xf32>
    %cst_84 = arith.constant 1.000000e+00 : f32
    %214 = vector.broadcast %cst_84 : f32 to vector<16x16xf32>
    %215 = arith.subf %214, %26 : vector<16x16xf32>
    %216 = arith.truncf %215 : vector<16x16xf32> to vector<16x16xbf16>
    %cst_85 = arith.constant 0.000000e+00 : f32
    %217 = vector.broadcast %cst_85 : f32 to vector<16x16xf32>
    %c7_i32_86 = arith.constant 7 : i32
    %218 = vector.broadcast %c7_i32_86 : i32 to vector<16x16xi32>
    %219 = arith.cmpi sle, %8, %218 : vector<16x16xi32>
    %220 = arith.extui %219 : vector<16x16xi1> to vector<16x16xi32>
    %221 = arith.sitofp %220 : vector<16x16xi32> to vector<16x16xf32>
    %222 = arith.truncf %221 : vector<16x16xf32> to vector<16x16xbf16>
    %cst_87 = arith.constant dense<0.000000e+00> : vector<16x16xf32>
    %223 = tpu.matmul %216, %222, %cst_87 {dimension_numbers = #tpu.dot_dimension_numbers<[1], [0], [0], [1], [0, 0, 1, 1], [], []>} : vector<16x16xbf16>, vector<16x16xbf16>, vector<16x16xf32> -> vector<16x16xf32>
    %c7_i32_88 = arith.constant 7 : i32
    %224 = tpu.dynamic_rotate %223 by %c7_i32_88 dim 0 : vector<16x16xf32>, i32 -> vector<16x16xf32>
    %c7_i32_89 = arith.constant 7 : i32
    %225 = vector.broadcast %c7_i32_89 : i32 to vector<16x16xi32>
    %226 = arith.cmpi sge, %4, %225 : vector<16x16xi32>
    %cst_90 = arith.constant 0.000000e+00 : f32
    %227 = vector.broadcast %cst_90 : f32 to vector<16x16xf32>
    %228 = arith.select %226, %224, %227 : vector<16x16xi1>, vector<16x16xf32>
    %229 = arith.addf %217, %228 : vector<16x16xf32>
    %c6_i32_91 = arith.constant 6 : i32
    %230 = tpu.dynamic_rotate %223 by %c6_i32_91 dim 0 : vector<16x16xf32>, i32 -> vector<16x16xf32>
    %c6_i32_92 = arith.constant 6 : i32
    %231 = vector.broadcast %c6_i32_92 : i32 to vector<16x16xi32>
    %232 = arith.cmpi sge, %4, %231 : vector<16x16xi32>
    %cst_93 = arith.constant 0.000000e+00 : f32
    %233 = vector.broadcast %cst_93 : f32 to vector<16x16xf32>
    %234 = arith.select %232, %230, %233 : vector<16x16xi1>, vector<16x16xf32>
    %235 = arith.addf %229, %234 : vector<16x16xf32>
    %c5_i32_94 = arith.constant 5 : i32
    %236 = tpu.dynamic_rotate %223 by %c5_i32_94 dim 0 : vector<16x16xf32>, i32 -> vector<16x16xf32>
    %c5_i32_95 = arith.constant 5 : i32
    %237 = vector.broadcast %c5_i32_95 : i32 to vector<16x16xi32>
    %238 = arith.cmpi sge, %4, %237 : vector<16x16xi32>
    %cst_96 = arith.constant 0.000000e+00 : f32
    %239 = vector.broadcast %cst_96 : f32 to vector<16x16xf32>
    %240 = arith.select %238, %236, %239 : vector<16x16xi1>, vector<16x16xf32>
    %241 = arith.addf %235, %240 : vector<16x16xf32>
    %c4_i32_97 = arith.constant 4 : i32
    %242 = tpu.dynamic_rotate %223 by %c4_i32_97 dim 0 : vector<16x16xf32>, i32 -> vector<16x16xf32>
    %c4_i32_98 = arith.constant 4 : i32
    %243 = vector.broadcast %c4_i32_98 : i32 to vector<16x16xi32>
    %244 = arith.cmpi sge, %4, %243 : vector<16x16xi32>
    %cst_99 = arith.constant 0.000000e+00 : f32
    %245 = vector.broadcast %cst_99 : f32 to vector<16x16xf32>
    %246 = arith.select %244, %242, %245 : vector<16x16xi1>, vector<16x16xf32>
    %247 = arith.addf %241, %246 : vector<16x16xf32>
    %c3_i32_100 = arith.constant 3 : i32
    %248 = tpu.dynamic_rotate %223 by %c3_i32_100 dim 0 : vector<16x16xf32>, i32 -> vector<16x16xf32>
    %c3_i32_101 = arith.constant 3 : i32
    %249 = vector.broadcast %c3_i32_101 : i32 to vector<16x16xi32>
    %250 = arith.cmpi sge, %4, %249 : vector<16x16xi32>
    %cst_102 = arith.constant 0.000000e+00 : f32
    %251 = vector.broadcast %cst_102 : f32 to vector<16x16xf32>
    %252 = arith.select %250, %248, %251 : vector<16x16xi1>, vector<16x16xf32>
    %253 = arith.addf %247, %252 : vector<16x16xf32>
    %c2_i32_103 = arith.constant 2 : i32
    %254 = tpu.dynamic_rotate %223 by %c2_i32_103 dim 0 : vector<16x16xf32>, i32 -> vector<16x16xf32>
    %c2_i32_104 = arith.constant 2 : i32
    %255 = vector.broadcast %c2_i32_104 : i32 to vector<16x16xi32>
    %256 = arith.cmpi sge, %4, %255 : vector<16x16xi32>
    %cst_105 = arith.constant 0.000000e+00 : f32
    %257 = vector.broadcast %cst_105 : f32 to vector<16x16xf32>
    %258 = arith.select %256, %254, %257 : vector<16x16xi1>, vector<16x16xf32>
    %259 = arith.addf %253, %258 : vector<16x16xf32>
    %c1_i32_106 = arith.constant 1 : i32
    %260 = tpu.dynamic_rotate %223 by %c1_i32_106 dim 0 : vector<16x16xf32>, i32 -> vector<16x16xf32>
    %c1_i32_107 = arith.constant 1 : i32
    %261 = vector.broadcast %c1_i32_107 : i32 to vector<16x16xi32>
    %262 = arith.cmpi sge, %4, %261 : vector<16x16xi32>
    %cst_108 = arith.constant 0.000000e+00 : f32
    %263 = vector.broadcast %cst_108 : f32 to vector<16x16xf32>
    %264 = arith.select %262, %260, %263 : vector<16x16xi1>, vector<16x16xf32>
    %265 = arith.addf %259, %264 : vector<16x16xf32>
    %266 = arith.addf %265, %223 : vector<16x16xf32>
    %c15_i32_109 = arith.constant 15 : i32
    %267 = tpu.dynamic_rotate %223 by %c15_i32_109 dim 0 : vector<16x16xf32>, i32 -> vector<16x16xf32>
    %c15_i32_110 = arith.constant 15 : i32
    %268 = vector.broadcast %c15_i32_110 : i32 to vector<16x16xi32>
    %269 = arith.cmpi slt, %4, %268 : vector<16x16xi32>
    %cst_111 = arith.constant 0.000000e+00 : f32
    %270 = vector.broadcast %cst_111 : f32 to vector<16x16xf32>
    %271 = arith.select %269, %267, %270 : vector<16x16xi1>, vector<16x16xf32>
    %272 = arith.addf %266, %271 : vector<16x16xf32>
    %c14_i32_112 = arith.constant 14 : i32
    %273 = tpu.dynamic_rotate %223 by %c14_i32_112 dim 0 : vector<16x16xf32>, i32 -> vector<16x16xf32>
    %c14_i32_113 = arith.constant 14 : i32
    %274 = vector.broadcast %c14_i32_113 : i32 to vector<16x16xi32>
    %275 = arith.cmpi slt, %4, %274 : vector<16x16xi32>
    %cst_114 = arith.constant 0.000000e+00 : f32
    %276 = vector.broadcast %cst_114 : f32 to vector<16x16xf32>
    %277 = arith.select %275, %273, %276 : vector<16x16xi1>, vector<16x16xf32>
    %278 = arith.addf %272, %277 : vector<16x16xf32>
    %c13_i32_115 = arith.constant 13 : i32
    %279 = tpu.dynamic_rotate %223 by %c13_i32_115 dim 0 : vector<16x16xf32>, i32 -> vector<16x16xf32>
    %c13_i32_116 = arith.constant 13 : i32
    %280 = vector.broadcast %c13_i32_116 : i32 to vector<16x16xi32>
    %281 = arith.cmpi slt, %4, %280 : vector<16x16xi32>
    %cst_117 = arith.constant 0.000000e+00 : f32
    %282 = vector.broadcast %cst_117 : f32 to vector<16x16xf32>
    %283 = arith.select %281, %279, %282 : vector<16x16xi1>, vector<16x16xf32>
    %284 = arith.addf %278, %283 : vector<16x16xf32>
    %c12_i32_118 = arith.constant 12 : i32
    %285 = tpu.dynamic_rotate %223 by %c12_i32_118 dim 0 : vector<16x16xf32>, i32 -> vector<16x16xf32>
    %c12_i32_119 = arith.constant 12 : i32
    %286 = vector.broadcast %c12_i32_119 : i32 to vector<16x16xi32>
    %287 = arith.cmpi slt, %4, %286 : vector<16x16xi32>
    %cst_120 = arith.constant 0.000000e+00 : f32
    %288 = vector.broadcast %cst_120 : f32 to vector<16x16xf32>
    %289 = arith.select %287, %285, %288 : vector<16x16xi1>, vector<16x16xf32>
    %290 = arith.addf %284, %289 : vector<16x16xf32>
    %c11_i32_121 = arith.constant 11 : i32
    %291 = tpu.dynamic_rotate %223 by %c11_i32_121 dim 0 : vector<16x16xf32>, i32 -> vector<16x16xf32>
    %c11_i32_122 = arith.constant 11 : i32
    %292 = vector.broadcast %c11_i32_122 : i32 to vector<16x16xi32>
    %293 = arith.cmpi slt, %4, %292 : vector<16x16xi32>
    %cst_123 = arith.constant 0.000000e+00 : f32
    %294 = vector.broadcast %cst_123 : f32 to vector<16x16xf32>
    %295 = arith.select %293, %291, %294 : vector<16x16xi1>, vector<16x16xf32>
    %296 = arith.addf %290, %295 : vector<16x16xf32>
    %c10_i32_124 = arith.constant 10 : i32
    %297 = tpu.dynamic_rotate %223 by %c10_i32_124 dim 0 : vector<16x16xf32>, i32 -> vector<16x16xf32>
    %c10_i32_125 = arith.constant 10 : i32
    %298 = vector.broadcast %c10_i32_125 : i32 to vector<16x16xi32>
    %299 = arith.cmpi slt, %4, %298 : vector<16x16xi32>
    %cst_126 = arith.constant 0.000000e+00 : f32
    %300 = vector.broadcast %cst_126 : f32 to vector<16x16xf32>
    %301 = arith.select %299, %297, %300 : vector<16x16xi1>, vector<16x16xf32>
    %302 = arith.addf %296, %301 : vector<16x16xf32>
    %c9_i32_127 = arith.constant 9 : i32
    %303 = tpu.dynamic_rotate %223 by %c9_i32_127 dim 0 : vector<16x16xf32>, i32 -> vector<16x16xf32>
    %c9_i32_128 = arith.constant 9 : i32
    %304 = vector.broadcast %c9_i32_128 : i32 to vector<16x16xi32>
    %305 = arith.cmpi slt, %4, %304 : vector<16x16xi32>
    %cst_129 = arith.constant 0.000000e+00 : f32
    %306 = vector.broadcast %cst_129 : f32 to vector<16x16xf32>
    %307 = arith.select %305, %303, %306 : vector<16x16xi1>, vector<16x16xf32>
    %308 = arith.addf %302, %307 : vector<16x16xf32>
    %309 = arith.mulf %213, %308 : vector<16x16xf32>
    %cst_130 = arith.constant 5.000000e-01 : f32
    %310 = vector.broadcast %cst_130 : f32 to vector<16x16xf32>
    %311 = arith.cmpf ogt, %309, %310 : vector<16x16xf32>
    %312 = arith.extui %311 : vector<16x16xi1> to vector<16x16xi32>
    %313 = arith.sitofp %312 : vector<16x16xi32> to vector<16x16xf32>
    %cst_131 = arith.constant 0.000000e+00 : f32
    %314 = vector.broadcast %cst_131 : f32 to vector<1x1xf32>
    %315 = arith.cmpf ogt, %22, %314 : vector<1x1xf32>
    %316 = vector.shape_cast %315 : vector<1x1xi1> to vector<1x1xi1>
    %317 = vector.broadcast %316 : vector<1x1xi1> to vector<16x16xi1>
    %318 = arith.select %317, %17, %313 : vector<16x16xi1>, vector<16x16xf32>
    %319 = arith.truncf %318 : vector<16x16xf32> to vector<16x16xbf16>
    %320 = vector.shape_cast %319 : vector<16x16xbf16> to vector<1x16x16xbf16>
    %c0_132 = arith.constant 0 : index
    %c0_133 = arith.constant 0 : index
    %c0_134 = arith.constant 0 : index
    %321 = vector.load %arg5[%c0_132, %c0_133, %c0_134] : memref<1x16x16xbf16, #tpu.memory_space<vmem>>, vector<1x16x16xbf16>
    tpu.vector_store %arg5[%c0_132, %c0_133, %c0_134], %320 {strides = array<i32>} : memref<1x16x16xbf16, #tpu.memory_space<vmem>>, vector<1x16x16xbf16>,
    %322 = vector.shape_cast %22 : vector<1x1xf32> to vector<1x1x1xf32>
    %c0_135 = arith.constant 0 : index
    %c0_136 = arith.constant 0 : index
    %c0_137 = arith.constant 0 : index
    %323 = vector.load %arg6[%c0_135, %c0_136, %c0_137] : memref<1x1x1xf32, #tpu.memory_space<vmem>>, vector<1x1x1xf32>
    tpu.vector_store %arg6[%c0_135, %c0_136, %c0_137], %322 {strides = array<i32>} : memref<1x1x1xf32, #tpu.memory_space<vmem>>, vector<1x1x1xf32>,
    return
  }
  func.func @transform_0(%arg0: i32, %arg1: memref<2xi32, #tpu.memory_space<smem>>) -> (i32, i32, i32, i32) {
    %0 = arith.index_cast %arg0 : i32 to index
    %1 = memref.load %arg1[%0] : memref<2xi32, #tpu.memory_space<smem>>
    %c12_i32 = arith.constant 12 : i32
    %2 = arith.addi %1, %c12_i32 : i32
    %c0_i32 = arith.constant 0 : i32
    %c0_i32_0 = arith.constant 0 : i32
    %c0_i32_1 = arith.constant 0 : i32
    return %arg0, %2, %c0_i32, %c0_i32_0 : i32, i32, i32, i32
  }
  func.func @transform_1(%arg0: i32, %arg1: memref<2xi32, #tpu.memory_space<smem>>) -> (i32, i32, i32, i32) {
    %c1_i32 = arith.constant 1 : i32
    %c0_i32 = arith.constant 0 : i32
    %c0_i32_0 = arith.constant 0 : i32
    %c0_i32_1 = arith.constant 0 : i32
    return %arg0, %c1_i32, %c0_i32, %c0_i32_0 : i32, i32, i32, i32
  }
  func.func @transform_2(%arg0: i32, %arg1: memref<2xi32, #tpu.memory_space<smem>>) -> (i32, i32, i32, i32) {
    %c5_i32 = arith.constant 5 : i32
    %c0_i32 = arith.constant 0 : i32
    %c0_i32_0 = arith.constant 0 : i32
    %c0_i32_1 = arith.constant 0 : i32
    return %arg0, %c5_i32, %c0_i32, %c0_i32_0 : i32, i32, i32, i32
  }
  func.func @transform_3(%arg0: i32, %arg1: memref<2xi32, #tpu.memory_space<smem>>) -> (i32, i32, i32) {
    %c0_i32 = arith.constant 0 : i32
    %c0_i32_0 = arith.constant 0 : i32
    %c0_i32_1 = arith.constant 0 : i32
    return %arg0, %c0_i32, %c0_i32_0 : i32, i32, i32
  }
  func.func @transform_4(%arg0: i32, %arg1: memref<2xi32, #tpu.memory_space<smem>>) -> (i32, i32, i32) {
    %c0_i32 = arith.constant 0 : i32
    %c0_i32_0 = arith.constant 0 : i32
    %c0_i32_1 = arith.constant 0 : i32
    return %arg0, %c0_i32, %c0_i32_0 : i32, i32, i32
  }
}

</mosaic_0001>

<bundles_post_ra>
// kernel: tpu_custom_call.1
= control target key start
LH: loop header
LB: loop body
LE: loop exit
PB: predicated region body
PF: predicated region fallthrough
CT: control target
= control target key end

     0   :  { %s1411_s21 = smov [#allocation3]   ;;  %s2034_s0 = inlined_call_operand.hbm [shape: s32[2], index: 0, kind: input, shape index: {}]   ;;  %s2035_s1 = inlined_call_operand.hbm [shape: f32[2,16,16,16], index: 1, kind: input, shape index: {}]   ;;  %s2036_s2 = inlined_call_operand.hbm [shape: f32[2,16,16,16], index: 2, kind: input, shape index: {}]   ;;  %s2037_s3 = inlined_call_operand.hbm [shape: f32[2,16,16,16], index: 3, kind: input, shape index: {}]   ;;  %s2038_s4 = inlined_call_operand.hbm [shape: bf16[2,16,16], index: 4, kind: output, shape index: {0}]   ;;  %s2039_s5 = inlined_call_operand.vmem [shape: f32[2,1,1], index: 5, kind: output, shape index: {1}]  }
   0x1   :  { %2063 = sst [smem:[#allocation25_spill]] %s2036_s2  ;;  %s12_s20 = sshll.u32 %s2034_s0, 4  ;;  %s13_s20 = int_to_ptr.hbm [resolvable:$true] %s12_s20 }
   0x2   :  { %2064 = sst [smem:[#allocation26_spill]] %s2037_s3 }
   0x3   :  { %2065 = sst [smem:[#allocation27_spill]] %s2038_s4 }
   0x4   :  { %2066 = sst [smem:[#allocation28_spill]] %s2039_s5 }
   0x5   :  { %15 = dma.hbm_to_smem %s13_s20, 16, %s1411_s21, [#allocation2] }
   0x6   :  { %1369 = dma.done.wait [#allocation2], 16 }
   0x7   :  { %1370 = vsyncadd [#allocation2], 4294967280 }
   0x8   :  { %18 = sfence }
   0x9   :  { %19 = vsyncpa [#allocation5], 0 }
   0xa   :  { %21 = vsyncpa [#allocation5 + $0x1], 0 }
   0xb   :  { %22 = vsyncpa [#allocation8], 0 }
   0xc   :  { %24 = vsyncpa [#allocation8 + $0x1], 0 }
   0xd   :  { %25 = vsyncpa [#allocation6], 0 }
   0xe   :  { %27 = vsyncpa [#allocation6 + $0x1], 0  ;;  %s1451_s22 = smov 0   ;;  %s1453_s23 = smov 0  }
   0xf   :  { %s1455_s24 = smov 0   ;;  %s1457_s25 = smov 0  }
  0x10   :  { %s1459_s0 = smov 0   ;;  %s1461_s26 = smov 0  }
  0x11   :  { %s1463_s27 = smov 0  }
  0x12 LB: > { %2067 = sst [smem:[#allocation17_spill]] %s1385_s22  ;;  %s1487_s28 = sadd.s32 4294967295, %s1409_s27   ;;  %s1409_s27 = sphi %s1463_s27, %s2111_s27   ;;  %s1405_s26 = sphi %s1461_s26, %s2119_s26   ;;  %s1401_s0 = sphi %s1459_s0, %s2118_s0   ;;  %s1397_s25 = sphi %s1457_s25, %s2117_s25   ;;  %s1393_s24 = sphi %s1455_s24, %s2113_s24   ;;  %s1389_s23 = sphi %s1453_s23, %s2116_s23   ;;  %s1385_s22 = sphi %s1451_s22, %s2115_s22  }
  0x13   : > { %2068 = sst [smem:[#allocation18_spill]] %s1393_s24  ;;  %s1048_s29 = sadd.s32 4294967294, %s1409_s27  }
  0x14   : > { %s1491_s30 = sadd.s32 1, %s1409_s27   ;;  %p54_p0 = scmp.eq.s32.totalorder %s1409_s27, 0 }
  0x15   : > { %2069 = sst [smem:[#allocation19_spill]] %s1491_s30  ;;  %s1496_s6 = ssub.s32 %s1409_s27, %s1491_s30 }
  0x16   : > { %p60_p1 = scmp.eq.s32.totalorder %s1487_s28, 0  ;;  %p70_p2 = scmp.eq.s32.totalorder %s1496_s6, 0 }
  0x17   : > { %s72_s7 = sadd.s32 1, %s1393_s24  ;;  %p79_p3 = scmp.ne.s32.totalorder %s1393_s24, %s1389_s23 }
  0x18   : > { %p85_p4 = scmp.ne.s32.totalorder %s1389_s23, %s1385_s22  ;;  %p135_p7 = scmp.eq.s32.totalorder %s1487_s28, 1 }
  0x19   : > { %s1506_s8 = scalar_select %p70_p2, %s1393_s24, %s72_s7  }
  0x1a   : > { %p1510_p5 = por %p79_p3, %p54_p0  ;;  %p1516_p6 = por %p85_p4, %p60_p1 }
  0x1b   : > { %2070 = sst [smem:[#allocation20_spill]] %s1506_s8  ;;  %p141_p8 = scmp.eq.s32.totalorder %s1048_s29, 1 }
  0x1c   : > { %p2041_p10 = scmp.lt.s32.totalorder %s1409_s27, 2  ;;  %p1523_p11 = por %p135_p7, %p79_p3 }
  0x1d   : > { %p1527_p12 = por %p141_p8, %p85_p4  ;;  %s213_s13 = sand.u32 1, %s1409_s27  }
  0x1e   : > { %s2073_s11 = scalar_select %p1523_p11, 1, 0 }
  0x1f   : > { %s2075_s12 = scalar_select %p1527_p12, 1, 0 }
  0x20   : > { %2074 = sst [smem:[#allocation21_spill]] %s2073_s11  ;;  %s215_s14 = sand.u32 1, %s1393_s24  }
  0x21   : > { %2076 = sst [smem:[#allocation22_spill]] %s2075_s12  ;;  %s1533_s15 = sshll.u32 %s215_s14, 4 }
  0x22   : > { %s1115_s16 = sshll.u32 %s1409_s27, 8  ;;  %s2077_s2 = sld [smem:[#allocation25_spill]] }
  0x23   : > { %s217_s20 = scalar_lea.vmem [#allocation7], %s1533_s15  ;;  %p1546_p13 = pnand %p2041_p10, %p1510_p5 }
  0x24   : > { %s226_s21 = sshll.u32 %s217_s20, 4  ;;  %s1550_s14 = scalar_lea.sflag [#allocation8], %s213_s13  ;;  %s227_s21 = int_to_ptr.vmem [resolvable:$true] %s226_s21 }
  0x25   : > { %p2049_p3 = pneg %p1546_p13 }
  0x28   : > { %s955_s19 = scalar_lea.hbm %s2077_s2, %s1115_s16 }
  0x29   : > { %s956_s29 = scalar_lea.hbm %s955_s19, 16  ;;  %s1230_s19 = scalar_lea.hbm %s2077_s2, 512 }
  0x2a   : > { %s224_s7 = sshll.u32 %s956_s29, 4  ;;  %s225_s7 = int_to_ptr.hbm [resolvable:$true] %s224_s7 }
  0x2b   : > { %s1223_s24 = sshra.s32 %s225_s7, 4  ;;  %s1224_s24 = int_to_ptr.hbm [resolvable:$true] %s1223_s24 }
  0x2c   : > { %s1225_s17 = scalar_lea.hbm %s1224_s24, 16  ;;  %p1231_p5 = scmp.lt.s32.totalorder %s1224_s24, %s2077_s2 }
  0x2d   : > { %p1226_p2 = scmp.ne.s32.totalorder %s1224_s24, %s1225_s17  ;;  %p1232_p8 = scmp.lt.s32.totalorder %s1230_s19, %s1225_s17 }
  0x2f   : > { %p1228_p4 = pnand %p2049_p3, %p1226_p2  ;;  %p1233_p9 = por %p1232_p8, %p1231_p5 }
  0x31   : > { %p1229_p7 = pneg %p1228_p4 }
  0x33   : > { %p1234_p10 = pnand %p1233_p9, %p1229_p7 }
  0x35   : > { %1237 = shalt.err (!%p1234_p10)
}
  0x36   : > { %s2042_s13 = smov 128   ;;  %s2044_s9 = smov 8  }
  0x37   : > { %1138 = dma.hbm_to_vmem [thread:$0]  (!%p1546_p13), %s225_s7, 256, %s227_s21, %s1550_s14, %s2042_s13, %s2042_s13, %s2044_s9  }
  0x38   : > { %s2079_s3 = sld [smem:[#allocation26_spill]]  ;;  %p1061_p9 = scmp.ge.s32.totalorder %s1409_s27, 1 }
  0x39   : > { %p257_p10 = scmp.lt.s32.totalorder %s1409_s27, 3  ;;  %s37_s20 = sld [smem:[#allocation3 + %s1409_s27]] }
  0x3a   : > { %s39_s2 = sld [smem:[#allocation3 + %s1491_s30]]  ;;  %s240_s21 = scalar_lea.vmem [#allocation9], %s1533_s15 }
  0x3b   : > { %p1576_p2 = pnand %p1061_p9, %p257_p10  ;;  %s1583_s7 = sshll.u32 %s240_s21, 4 }
  0x3c   : > { %2081 = sst [smem:[#allocation23_spill]] %s1583_s7  ;;  %p59_p4 = scmp.ne.s32.totalorder %s1401_s0, %s1397_s25 }
  0x3d   : > { %p53_p7 = scmp.ne.s32.totalorder %s1405_s26, %s1401_s0  ;;  %s46_s17 = sadd.s32 1, %s1405_s26 }
  0x3e   : > { %s962_s18 = scalar_lea.hbm %s2079_s3, %s1115_s16  ;;  %p1591_p5 = por %p60_p1, %p59_p4 }
  0x3f   : > { %s963_s29 = scalar_lea.hbm %s962_s18, 80  ;;  %s38_s15 = sadd.s32 12, %s37_s20 }
  0x40   : > { %s1595_s24 = sshll.u32 %s963_s29, 4  ;;  %s40_s18 = sadd.s32 12, %s39_s2  ;;  %s248_s24 = int_to_ptr.hbm [resolvable:$true] %s1595_s24 }
  0x41   : > { %p55_p8 = por %p54_p0, %p53_p7  ;;  %s42_s25 = ssub.s32 %s38_s15, %s40_s18 }
  0x42   : > { %s2050_s21 = sand.u32 1, %s1405_s26   ;;  %s43_s13 = sor.u32 %s42_s25, %s1496_s6 }
  0x43   : > { %p2083_p1 = scmp.lt.s32.totalorder %s1409_s27, 2  ;;  %p44_p10 = scmp.eq.s32.totalorder %s43_s13, 0 }
  0x44   : > { %s1120_s29 = scalar_select %p55_p8, [#allocation3], [#allocation11] }
  0x45   : > { %p1605_p9 = pnand %p2083_p1, %p55_p8  ;;  %p2086_p4 = pmov %p2083_p1 }
  0x46   : > { %s1611_s30 = scalar_select %p44_p10, %s1405_s26, %s46_s17  }
  0x47   : > { %s1121_s7 = scalar_select %p55_p8, %s1409_s27, 0 }
  0x48   : > { %2085 = sst [smem:[#allocation24_spill]] %s1611_s30  ;;  %s2121_s29 = smov (!%p2086_p4, %s1120_s29), [#allocation12] }
  0x49   : > { %p2087_p3 = pmov %p2083_p1  ;;  %s1051_s2 = sshll.u32 %s2050_s21, 4 }
  0x4a   : > { %s1253_s15 = sshra.s32 %s248_s24, 4  ;;  %p2088_p7 = pneg %p1546_p13  ;;  %s1254_s15 = int_to_ptr.hbm [resolvable:$true] %s1253_s15 }
  0x4b   : > { %s2123_s7 = smov (!%p2087_p3, %s1121_s7), 0  ;;  %s1255_s6 = scalar_lea.hbm %s1254_s15, 16 }
  0x4c   : > { %s192_s20 = sld [smem:[%s2121_s29 + %s2123_s7]]  ;;  %p1256_p0 = scmp.ne.s32.totalorder %s1254_s15, %s1255_s6 }
  0x4d   : > { %s1260_s17 = scalar_lea.hbm %s2079_s3, 512  ;;  %p1261_p8 = scmp.lt.s32.totalorder %s1254_s15, %s2079_s3 }
  0x4e   : > { %p1258_p1 = pnand %p1256_p0, %p2088_p7  ;;  %p1262_p3 = scmp.lt.s32.totalorder %s1260_s17, %s1255_s6 }
  0x50   : > { %p1259_p12 = pneg %p1258_p1  ;;  %p1263_p10 = por %p1262_p3, %p1261_p8 }
  0x52   : > { %p1264_p4 = pnand %p1263_p10, %p1259_p12 }
  0x54   : > { %1267 = shalt.err (!%p1264_p4)
}
  0x55   : > { %s2089_s7 = smov 8   ;;  %s2090_s29 = smov 128  }
  0x56   : > { %s2091_s21 = sld [smem:[#allocation23_spill]]  ;;  %s1053_s13 = sshll.u32 %s1409_s27, 5 }
  0x57   : > { %s1052_s18 = sshll.u32 %s192_s20, 1  ;;  %s191_s15 = scalar_lea.vmem [#allocation4], %s1051_s2 }
  0x58   : > { %s946_s30 = sadd.s32 %s1053_s13, %s1052_s18  ;;  %s203_s6 = sshll.u32 %s191_s15, 4  ;;  %s204_s6 = int_to_ptr.vmem [resolvable:$true] %s203_s6 }
  0x59   : > { %s1054_s17 = sshll.u32 %s946_s30, 3  ;;  %s2093_s4 = sand.u32 1, %s1405_s26  }
  0x5a   : > { %s948_s8 = scalar_lea.hbm %s2035_s1, %s1054_s17  ;;  %s1290_s2 = scalar_lea.hbm %s2035_s1, 512 }
  0x5b   : > { %s949_s22 = scalar_lea.hbm %s948_s8, 192 }
  0x5c   : > { %s2092_s12 = int_to_ptr.vmem [resolvable:$true] %s2091_s21  ;;  %s201_s11 = sshll.u32 %s949_s22, 4  ;;  %s202_s11 = int_to_ptr.hbm [resolvable:$true] %s201_s11 }
  0x5d   : > { %1141 = dma.hbm_to_vmem [thread:$0]  (!%p1546_p13), %s248_s24, 256, %s2092_s12, %s1550_s14, %s2090_s29, %s2090_s29, %s2089_s7  }
  0x5e   : > { %s188_s21 = scalar_lea.sflag [#allocation5], %s2093_s4  ;;  %s1283_s5 = sshra.s32 %s202_s11, 4  ;;  %s1284_s5 = int_to_ptr.hbm [resolvable:$true] %s1283_s5 }
  0x5f   : > { %s1285_s12 = scalar_lea.hbm %s1284_s5, 16  ;;  %p1287_p13 = pneg %p1605_p9 }
  0x60   : > { %p1286_p12 = scmp.ne.s32.totalorder %s1284_s5, %s1285_s12  ;;  %p1291_p1 = scmp.lt.s32.totalorder %s1284_s5, %s2035_s1 }
  0x61   : > { %p1292_p8 = scmp.lt.s32.totalorder %s1290_s2, %s1285_s12 }
  0x62   : > { %p1288_p0 = pnand %p1287_p13, %p1286_p12 }
  0x63   : > { %p1293_p3 = por %p1292_p8, %p1291_p1 }
  0x64   : > { %p1289_p7 = pneg %p1288_p0 }
  0x66   : > { %p1294_p10 = pnand %p1293_p3, %p1289_p7 }
  0x68   : > { %1297 = shalt.err (!%p1294_p10)
}
  0x69   : > { %1135 = dma.hbm_to_vmem [thread:$0]  (!%p1605_p9), %s202_s11, 256, %s204_s6, %s188_s21, %s2090_s29, %s2090_s29, %s2089_s7  }
  0x6a   : > { %261 = sbr.rel (%p1576_p2) target bundleno = 471 (0x1d7), region = 32  ;;  %s263_s4 = sand.u32 (!%p1576_p2), 1, %s1401_s0  }
  0x6b   : > { %s1659_s22 = sshll.u32 (!%p1576_p2), %s263_s4, 4  ;;  %s264_s5 = scalar_lea.sflag (!%p1576_p2), [#allocation5], %s263_s4 }
  0x6c   : > { %s267_s13 = scalar_lea.vmem (!%p1576_p2), [#allocation4], %s1659_s22 }
  0x6f   : > { %1372 = dma.done.wait (%p1591_p5), %s264_s5, 256  }
  0x70   : > { %1374 = vsyncadd (%p1591_p5), %s264_s5, 4294967040  ;;  %s273_s11 = sand.u32 1, %s1487_s28   ;;  %s1668_s9 = sand.u32 1, %s1389_s23  }
  0x71   : > { %s1063_s19 = sshll.u32 %s1668_s9, 4  ;;  %s274_s7 = scalar_lea.sflag [#allocation8], %s273_s11 }
  0x72   : > { %s277_s29 = scalar_lea.vmem [#allocation7], %s1063_s19 }
  0x73   : > { %1376 = dma.done.wait (%p1516_p6), %s274_s7, 512  }
  0x74   : > { %1378 = vsyncadd (%p1516_p6), %s274_s7, 4294966784  ;;  %v336_v0 = vlaneseq  ;;  %v332_v7 = vld [vmem:[%s277_s29] sm:$0xff]  ;;  %v333_v8 = vld [vmem:[%s277_s29 + $0x8] sm:$0xff]  ;;  %v1414_v12 = vmov 0.0   ;;  %v1415_v15 = vmov 1.0|1.0  }
  0x75   : > { %vm375_vm2 = vcmp.ne.f32.partialorder %v332_v7, 0.0  ;;  %vm376_vm5 = vcmp.ne.f32.partialorder %v333_v8, 0.0  ;;  %vm361_vm14 = vcmask 130048   ;;  %s287_s10 = scalar_lea.vmem [#allocation9], %s1063_s19  ;;  %v349_v24 = vld [vmem:[%s267_s13] sm:$0xff]  ;;  %v350_v25 = vld [vmem:[%s267_s13 + $0x8] sm:$0xff] }
  0x76   : > { %v1677_v1 = vshrl.u32 %v336_v0, 7  ;;  %v340_v2 = vand.u32 127, %v336_v0  ;;  %v1691_v13 = vsel %vm375_vm2, 1.0, %v1414_v12  ;;  %v1700_v14 = vsel %vm376_vm5, 1.0, %v1414_v12  ;;  %v334_v20 = vld [vmem:[%s287_s10] sm:$0xff]  ;;  %v335_v21 = vld [vmem:[%s287_s10 + $0x8] sm:$0xff] }
  0x77   : > { %v381_v16 = vpack.c.bf16 %v1700_v14, %v1691_v13  ;;  %v757_v17 = vsub.f32 1.0, %v1691_v13  ;;  %v758_v18 = vsub.f32 1.0, %v1700_v14  ;;  %v351_v22 = vsub.f32 1.0, %v334_v20  ;;  %p328_p6 = scmp.lt.s32.totalorder %s1487_s28, 1  ;;  %s2099_s15 = sld [smem:[#allocation28_spill]] }
  0x78   : > { %v1680_v3 = vadd.s32 8, %v1677_v1  ;;  %v341_v4 = vsub.s32 %v1677_v1, %v340_v2  ;;  %v352_v23 = vsub.f32 1.0, %v335_v21  ;;  %v382_v34 = vrot.slane %v1691_v13, 6  ;;  %s1065_s25 = sshll.u32 %s1668_s9, 3  ;;  %s1117_s8 = sshll.u32 %s1487_s28, 3 }
  0x79   : > { %v759_v19 = vpack.c.bf16 %v758_v18, %v757_v17  ;;  %v353_v26 = vmul.f32 %v351_v22, %v349_v24  ;;  %v383_v35 = vrot.slane %v1700_v14, 6  ;;  %v393_v36 = vrot.slane %v1691_v13, 2  ;;  %s329_s16 = scalar_select %p328_p6, %s1487_s28, 1 }
  0x7a   : > { %v342_v5 = vsub.s32 %v1680_v3, %v340_v2  ;;  %vm343_vm0 = vcmp.lt.s32.totalorder %v341_v4, 0  ;;  %v344_v6 = vsub.s32 0, %v341_v4  ;;  %v354_v27 = vmul.f32 %v352_v23, %v350_v25  ;;  %s2105_s14 = sld [smem:[#allocation27_spill]]  ;;  %s320_s2 = scalar_lea.vmem [#allocation10], %s1065_s25 }
  0x7b   : > { %v394_v37 = vrot.slane %v1700_v14, 2  ;;  %s899_s28 = sshll.u32 %s320_s2, 4  ;;  %s884_s4 = scalar_lea.sflag [#allocation6], %s1668_s9  ;;  %s900_s28 = int_to_ptr.vmem [resolvable:$true] %s899_s28 }
  0x7c   : > { %v1684_v9 = vsel %vm343_vm0, %v344_v6, %v341_v4  ;;  %vm346_vm1 = vcmp.lt.s32.totalorder %v342_v5, 0  ;;  %v347_v10 = vsub.s32 0, %v342_v5 }
  0x7d   : > { %vm403_vm3 = vcmp.le.s32.totalorder %v1684_v9, 4  ;;  %vm448_vm4 = vcmp.le.s32.totalorder %v1684_v9, 6  ;;  %vm481_vm8 = vcmp.le.s32.totalorder %v1684_v9, 7  ;;  %vm522_vm11 = vcmp.le.s32.totalorder %v1684_v9, 8  ;;  %s330_s6 = scalar_lea.vmem %s2099_s15, %s329_s16 }
  0x7e   : > { %v1687_v11 = vsel %vm346_vm1, %v347_v10, %v342_v5  ;;  %vm585_vm15 = vcmp.le.s32.totalorder %v1684_v9, 9  ;;  %vm683_vm2 = vcmp.le.s32.totalorder %v1684_v9, 10 }
  0x7f   : > { %vm404_vm6 = vcmp.le.s32.totalorder %v1687_v11, 4  ;;  %vm449_vm7 = vcmp.le.s32.totalorder %v1687_v11, 6  ;;  %vm482_vm9 = vcmp.le.s32.totalorder %v1687_v11, 7  ;;  %vm523_vm12 = vcmp.le.s32.totalorder %v1687_v11, 8 }
  0x80   : > { %vm1072_vm10 = vmpackc.low %vm404_vm6, %vm403_vm3  ;;  %vm586_vm0 = vcmp.le.s32.totalorder %v1687_v11, 9  ;;  %vm684_vm3 = vcmp.le.s32.totalorder %v1687_v11, 10  ;;  %s898_s24 = scalar_lea.hbm %s2105_s14, %s1117_s8  ;;  %s1333_s19 = scalar_lea.hbm %s2105_s14, 16 }
  0x81   : > { %1073 = vmatpush.bf16.msk.msra.mxu0 %vm1072_vm10, %v1415_v15  ;;  %vm1077_vm13 = vmpackc.low %vm449_vm7, %vm448_vm4  ;;  %vm355_vm7 = vcmp.eq.f32.partialorder %v353_v26, 1.0  ;;  %vm395_vm10 = vcmp.lt.s32.totalorder %v1677_v1, 6  ;;  %s901_s20 = sshll.u32 %s898_s24, 4  ;;  %s902_s20 = int_to_ptr.hbm [resolvable:$true] %s901_s20 }
  0x82   : > { %1078 = vmatpush.bf16.msk.msra.mxu1 %vm1077_vm13, %v1415_v15  ;;  %vm1082_vm1 = vmpackc.low %vm482_vm9, %vm481_vm8  ;;  %vm356_vm8 = vcmp.eq.f32.partialorder %v354_v27, 1.0  ;;  %v1733_v28 = vsel %vm355_vm7, 1.0, %v1414_v12  ;;  %vm2060_vm9 = vcmp.lt.s32.totalorder %v1677_v1, 2  ;;  %vm433_vm13 = vcmp.ge.s32.totalorder %v1680_v3, 9  ;;  %s1327_s22 = sshra.s32 %s902_s20, 4  ;;  %s1328_s22 = int_to_ptr.hbm [resolvable:$true] %s1327_s22 }
  0x83   : > { %1083 = vmatpush.bf16.msk.msra.mxu2 %vm1082_vm1, %v1415_v15  ;;  %vm1087_vm4 = vmpackc.low %vm523_vm12, %vm522_vm11  ;;  %v1736_v29 = vsel %vm356_vm8, 1.0, %v1414_v12  ;;  %v362_v30 = vsel %vm361_vm14, %v1733_v28, -inf  ;;  %v386_v39 = vsel %vm2060_vm9, %v383_v35, %v382_v34  ;;  %vm388_vm11 = vcmp.ge.s32.totalorder %v1680_v3, 10  ;;  %s1329_s5 = scalar_lea.hbm %s1328_s22, 8  ;;  %p1334_p4 = scmp.lt.s32.totalorder %s1328_s22, %s2105_s14 }
  0x84   : > { %1088 = vmatpush.bf16.msk.msra.mxu3 %vm1087_vm4, %v1415_v15  ;;  %1074 = vmatmul.msk.bf16.vlgmr.msra.gmra.mxu0 %vm361_vm14, %v381_v16  ;;  %vm1092_vm5 = vmpackc.low %vm586_vm0, %vm585_vm15  ;;  %v363_v31 = vsel %vm361_vm14, %v1736_v29, -inf  ;;  %vm429_vm12 = vcmp.lt.s32.totalorder %v1677_v1, 1  ;;  %v397_v42 = vsel %vm395_vm10, %v394_v37, %v393_v36  ;;  %vm440_vm15 = vcmp.lt.s32.totalorder %v1677_v1, 7  ;;  %p1330_p2 = scmp.ne.s32.totalorder %s1328_s22, %s1329_s5  ;;  %p1335_p12 = scmp.lt.s32.totalorder %s1333_s19, %s1329_s5 }
  0x85   : > { %1079 = vmatmul.msk.bf16.vlgmr.msra.gmra.mxu1 %vm361_vm14, %v381_v16  ;;  %1093 = vmatpush.bf16.msk.msrb.mxu0 %vm1092_vm5, %v1415_v15  ;;  %vm1097_vm6 = vmpackc.low %vm684_vm3, %vm683_vm2  ;;  %v364_v32 = vmax.f32 %v362_v30, %v363_v31  ;;  %v390_v48 = vsel %vm388_vm11, %v386_v39, 0.0  ;;  %v399_v50 = vsel %vm395_vm10, %v397_v42, 0.0  ;;  %vm506_vm0 = vcmp.ge.s32.totalorder %v1677_v1, 7 }
  0x86   : > { %1084 = vmatmul.msk.bf16.vlgmr.msra.gmra.mxu2 %vm361_vm14, %v381_v16  ;;  %1098 = vmatpush.bf16.msk.msrb.mxu1 %vm1097_vm6, %v1415_v15  ;;  %vm555_vm2 = vcmp.lt.s32.totalorder %v1677_v1, 5  ;;  %vm566_vm3 = vcmp.lt.s32.totalorder %v1677_v1, 3  ;;  %vm2057_vm4 = vcmp.ge.s32.totalorder %v1677_v1, 6  ;;  %vm558_vm5 = vcmp.ge.s32.totalorder %v1677_v1, 5  ;;  %p1331_p5 = pnand %p1330_p2, %p1523_p11  ;;  %p1336_p13 = por %p1335_p12, %p1334_p4 }
  0x87   : > { %1089 = vmatmul.msk.bf16.vlgmr.msra.gmra.mxu3 %vm361_vm14, %v381_v16  ;;  %365 = vmax.xlane.f32.xlu0 %v364_v32  ;;  %vm2058_vm6 = vcmp.lt.s32.totalorder %v1680_v3, 11  ;;  %vm608_vm7 = vcmp.lt.s32.totalorder %v1677_v1, 4  ;;  %vm2059_vm8 = vcmp.lt.s32.totalorder %v1680_v3, 10  ;;  %vm611_vm11 = vcmp.ge.s32.totalorder %v1677_v1, 4 }
  0x88   : > { %1106 = vmatpush.bf16.msk.msrb.mxu3 %vm1082_vm1, %v1415_v15  ;;  %vm2056_vm1 = vcmp.lt.s32.totalorder %v1680_v3, 9  ;;  %p1332_p9 = pneg %p1331_p5 }
  0x8a   : > { %p1337_p0 = pnand %p1336_p13, %p1332_p9 }
  0x94   : > { %1094 = vmatmul.msk.bf16.vlgmr.msrb.gmra.mxu0 %vm361_vm14, %v381_v16 }
  0x95   : > { %1099 = vmatmul.msk.bf16.vlgmr.msrb.gmra.mxu1 %vm361_vm14, %v381_v16 }
  0x97   : > { %1107 = vmatmul.msk.bf16.vlgmr.msrb.gmra.mxu3 %vm361_vm14, %v759_v19 }
 0x101   : > { %v422_v33 = vpop.f32.mrf.mxu0 }
 0x102   : > { %v464_v38 = vpop.f32.mrf.mxu1  ;;  %v427_v43 = vrot.slane %v422_v33, 7  ;;  %v438_v44 = vrot.slane %v422_v33, 1 }
 0x109   : > { %v497_v40 = vpop.f32.mrf.mxu2  ;;  %v424_v41 = vpop.f32.mrf.mxu0 }
 0x10a   : > { %v1756_v45 = vpop.f32.mrf.mxu3  ;;  %v428_v46 = vrot.slane %v424_v41, 7  ;;  %v439_v47 = vrot.slane %v424_v41, 1  ;;  %v502_v59 = vrot.slane %v497_v40, 1  ;;  %v512_v60 = vrot.slane %v497_v40, 7  ;;  %v466_v61 = vpop.f32.mrf.mxu1 }
 0x10b   : > { %v543_v2 = vrot.slane %v1756_v45, 2  ;;  %v553_v18 = vrot.slane %v1756_v45, 3  ;;  %v564_v21 = vrot.slane %v1756_v45, 5  ;;  %v575_v30 = vrot.slane %v1756_v45, 6 }
 0x10c   : > { %v431_v49 = vsel %vm429_vm12, %v428_v46, %v427_v43  ;;  %v442_v51 = vsel %vm440_vm15, %v439_v47, %v438_v44 }
 0x10d   : > { %v435_v52 = vsel %vm433_vm13, %v431_v49, 0.0  ;;  %v444_v53 = vsel %vm440_vm15, %v442_v51, 0.0  ;;  %vm2061_vm13 = vcmp.ge.s32.totalorder %v1677_v1, 3 }
 0x10e   : > { %v437_v54 = vadd.f32 %v435_v52, %v390_v48  ;;  %v446_v55 = vadd.f32 %v444_v53, %v399_v50 }
 0x110   : > { %v474_v56 = vadd.f32 %v464_v38, %v437_v54  ;;  %v479_v4 = vadd.f32 %v466_v61, %v446_v55 }
 0x111   : > { %v499_v57 = vpop.f32.mrf.mxu2  ;;  %v1772_v58 = vpop.f32.mrf.mxu0 }
 0x112   : > { %v503_v62 = vrot.slane %v499_v57, 1  ;;  %v513_v63 = vrot.slane %v499_v57, 7  ;;  %v540_v0 = vpop.f32.mrf.mxu3  ;;  %v606_v43 = vrot.slane %v1772_v58, 4  ;;  %v617_v48 = vrot.slane %v1772_v58, 5 }
 0x113   : > { %v544_v5 = vrot.slane %v540_v0, 2  ;;  %v554_v10 = vrot.slane %v540_v0, 3  ;;  %v565_v17 = vrot.slane %v540_v0, 5  ;;  %v576_v24 = vrot.slane %v540_v0, 6 }
 0x114   : > { %v504_v6 = vsel %vm440_vm15, %v502_v59, %v503_v62  ;;  %v505_v7 = vsel %vm440_vm15, %v503_v62, %v502_v59  ;;  %v515_v8 = vsel %vm429_vm12, %v513_v63, %v512_v60  ;;  %v514_v22 = vsel %vm429_vm12, %v512_v60, %v513_v63 }
 0x115   : > { %v508_v13 = vsel %vm506_vm0, %v505_v7, 0.0  ;;  %v511_v14 = vadd.f32 %v504_v6, %v474_v56  ;;  %v519_v16 = vsel %vm2056_vm1, %v515_v8, 0.0  ;;  %v546_v20 = vsel %vm395_vm10, %v544_v5, %v543_v2 }
 0x116   : > { %v510_v19 = vadd.f32 %v508_v13, %v479_v4  ;;  %v545_v26 = vsel %vm395_vm10, %v543_v2, %v544_v5  ;;  %v557_v27 = vsel %vm555_vm2, %v554_v10, %v553_v18  ;;  %v549_v31 = vsel %vm2057_vm4, %v546_v20, 0.0 }
 0x117   : > { %v521_v23 = vadd.f32 %v519_v16, %v511_v14  ;;  %v568_v33 = vsel %vm566_vm3, %v565_v17, %v564_v21  ;;  %v556_v36 = vsel %vm555_vm2, %v553_v18, %v554_v10  ;;  %vm2062_vm1 = vcmp.ge.s32.totalorder %v1677_v1, 2 }
 0x118   : > { %v520_v25 = vadd.f32 %v514_v22, %v510_v19  ;;  %v560_v38 = vsel %vm558_vm5, %v557_v27, 0.0  ;;  %v578_v41 = vsel %vm2060_vm9, %v576_v24, %v575_v30  ;;  %v572_v44 = vsel %vm2058_vm6, %v568_v33, 0.0  ;;  %v699_v22 = vpop.f32.mrf.mxu1 }
 0x119   : > { %v552_v32 = vadd.f32 %v545_v26, %v521_v23  ;;  %v1805_v34 = vpop.f32.mrf.mxu0  ;;  %vm641_vm4 = vcmp.ge.s32.totalorder %v1677_v1, 1  ;;  %v567_v45 = vsel %vm566_vm3, %v564_v21, %v565_v17  ;;  %v577_v50 = vsel %vm2060_vm9, %v575_v30, %v576_v24 }
 0x11a   : > { %v551_v35 = vadd.f32 %v549_v31, %v520_v25  ;;  %v607_v37 = vrot.slane %v1805_v34, 4  ;;  %v618_v39 = vrot.slane %v1805_v34, 5  ;;  %v628_v46 = vrot.slane %v1805_v34, 6 }
 0x11b   : > { %v563_v40 = vadd.f32 %v556_v36, %v552_v32  ;;  %v582_v52 = vsel %vm2059_vm8, %v578_v41, 0.0  ;;  %v638_v53 = vrot.slane %v1805_v34, 7  ;;  %v627_v56 = vrot.slane %v1772_v58, 6 }
 0x11c   : > { %v562_v42 = vadd.f32 %v560_v38, %v551_v35  ;;  %v610_v51 = vsel %vm608_vm7, %v607_v37, %v606_v43  ;;  %v620_v55 = vsel %vm566_vm3, %v618_v39, %v617_v48  ;;  %v637_v59 = vrot.slane %v1772_v58, 7 }
 0x11d   : > { %v574_v47 = vadd.f32 %v572_v44, %v563_v40  ;;  %v609_v60 = vsel %vm608_vm7, %v606_v43, %v607_v37  ;;  %vm652_vm6 = vcmp.lt.s32.totalorder %v1680_v3, 15  ;;  %v613_v61 = vsel %vm611_vm11, %v610_v51, 0.0 }
 0x11e   : > { %v573_v49 = vadd.f32 %v567_v45, %v562_v42  ;;  %v648_v62 = vrot.slane %v1805_v34, 1  ;;  %v630_v0 = vsel %vm2060_vm9, %v628_v46, %v627_v56  ;;  %v658_v2 = vrot.slane %v1805_v34, 2 }
 0x11f   : > { %v584_v54 = vadd.f32 %v582_v52, %v574_v47  ;;  %v619_v5 = vsel %vm566_vm3, %v617_v48, %v618_v39  ;;  %v623_v6 = vsel %vm2061_vm13, %v620_v55, 0.0  ;;  %v629_v8 = vsel %vm2060_vm9, %v627_v56, %v628_v46  ;;  %v366_v52 = vpop.xlane.xlu0 %365 }
 0x120   : > { %v583_v57 = vadd.f32 %v577_v50, %v573_v49  ;;  %v640_v10 = vsel %vm429_vm12, %v638_v53, %v637_v59  ;;  %v647_v13 = vrot.slane %v1772_v58, 1  ;;  %v633_v16 = vsel %vm2062_vm1, %v630_v0, 0.0  ;;  %v701_v43 = vpop.f32.mrf.mxu1 }
 0x121   : > { %v616_v63 = vadd.f32 %v609_v60, %v584_v54  ;;  %v657_v17 = vrot.slane %v1772_v58, 2  ;;  %vm727_vm8 = vcmp.le.s32.totalorder %v1684_v9, 1  ;;  %v668_v19 = vrot.slane %v1805_v34, 3 }
 0x122   : > { %v615_v4 = vadd.f32 %v613_v61, %v583_v57  ;;  %v650_v20 = vsel %vm440_vm15, %v648_v62, %v647_v13  ;;  %vm728_vm9 = vcmp.le.s32.totalorder %v1687_v11, 1  ;;  %v639_v23 = vsel %vm429_vm12, %v637_v59, %v638_v53  ;;  %v772_v57 = vpop.f32.mrf.mxu3 }
 0x123   : > { %v626_v7 = vadd.f32 %v619_v5, %v616_v63  ;;  %vm662_vm13 = vcmp.lt.s32.totalorder %v1680_v3, 14  ;;  %vm1102_vm1 = vmpackc.low %vm728_vm9, %vm727_vm8  ;;  %v643_v24 = vsel %vm641_vm4, %v640_v10, 0.0  ;;  %v667_v9 = vrot.slane %v1772_v58, 3 }
 0x124   : > { %v625_v14 = vadd.f32 %v623_v6, %v615_v4  ;;  %v660_v26 = vsel %vm395_vm10, %v658_v2, %v657_v17  ;;  %1103 = vmatpush.bf16.msk.msrb.mxu2 %vm1102_vm1, %v1415_v15  ;;  %v654_v27 = vsel %vm652_vm6, %v650_v20, 0.0  ;;  %v649_v30 = vsel %vm440_vm15, %v647_v13, %v648_v62 }
 0x125   : > { %v636_v18 = vadd.f32 %v629_v8, %v626_v7  ;;  %v670_v32 = vsel %vm555_vm2, %v668_v19, %v667_v9  ;;  %vm672_vm9 = vcmp.lt.s32.totalorder %v1680_v3, 13  ;;  %v664_v33 = vsel %vm662_vm13, %v660_v26, 0.0 }
 0x126   : > { %v635_v21 = vadd.f32 %v633_v16, %v625_v14  ;;  %v659_v15 = vsel %vm395_vm10, %v657_v17, %v658_v2  ;;  %vm678_vm1 = vcmp.lt.s32.totalorder %v1680_v3, 12  ;;  %v674_v36 = vsel %vm672_vm9, %v670_v32, 0.0 }
 0x127   : > { %v646_v25 = vadd.f32 %v639_v23, %v636_v18  ;;  %v669_v37 = vsel %vm555_vm2, %v667_v9, %v668_v19  ;;  %v680_v40 = vsel %vm678_vm1, %v610_v51, 0.0  ;;  %v367_v53 = vrot.slane %v366_v52, 4 }
 0x128   : > { %v645_v11 = vadd.f32 %v643_v24, %v635_v21  ;;  %v785_v61 = vrot.slane %v772_v57, 2  ;;  %v777_v0 = vrot.slane %v772_v57, 1  ;;  %v793_v2 = vrot.slane %v772_v57, 3 }
 0x129   : > { %v656_v31 = vadd.f32 %v654_v27, %v646_v25  ;;  %v368_v54 = vmax.f32 %v366_v52, %v367_v53  ;;  %v801_v14 = vrot.slane %v772_v57, 4  ;;  %v809_v20 = vrot.slane %v772_v57, 5 }
 0x12a   : > { %v655_v58 = vadd.f32 %v649_v30, %v645_v11  ;;  %v817_v25 = vrot.slane %v772_v57, 6  ;;  %vm878_vm8 = vcmask 125952  }
 0x12b   : > { %v666_v34 = vadd.f32 %v664_v33, %v656_v31  ;;  %v369_v51 = vrot.slane %v368_v54, 2 }
 0x12c   : > { %v665_v35 = vadd.f32 %v659_v15, %v655_v58  ;;  %v825_v58 = vrot.slane %v772_v57, 7 }
 0x12d   : > { %v676_v38 = vadd.f32 %v674_v36, %v666_v34  ;;  %v370_v55 = vmax.f32 %v368_v54, %v369_v51 }
 0x12e   : > { %v675_v39 = vadd.f32 %v669_v37, %v665_v35 }
 0x12f   : > { %v682_v41 = vadd.f32 %v680_v40, %v676_v38  ;;  %v371_v56 = vrot.slane %v370_v55, 1 }
 0x130   : > { %v681_v42 = vadd.f32 %v675_v39, %v609_v60  ;;  %v774_v60 = vpop.f32.mrf.mxu3 }
 0x131   : > { %v705_v44 = vadd.f32 %v701_v43, %v682_v41  ;;  %v372_v59 = vmax.f32 %v370_v55, %v371_v56  ;;  %v778_v62 = vrot.slane %v774_v60, 1  ;;  %v786_v63 = vrot.slane %v774_v60, 2 }
 0x132   : > { %v704_v45 = vadd.f32 %v699_v22, %v681_v42  ;;  %v794_v4 = vrot.slane %v774_v60, 3  ;;  %v802_v13 = vrot.slane %v774_v60, 4  ;;  %v810_v18 = vrot.slane %v774_v60, 5 }
 0x133   : > { %v707_v46 = vmin.f32 %v705_v44, 1.0  ;;  %1118 = vpush %v372_v59  ;;  %v780_v5 = vsel %vm440_vm15, %v778_v62, %v777_v0  ;;  %v788_v6 = vsel %vm395_vm10, %v786_v63, %v785_v61  ;;  %v779_v22 = vsel %vm440_vm15, %v777_v0, %v778_v62 }
 0x134   : > { %v706_v47 = vmin.f32 %v704_v45, 1.0  ;;  %v781_v7 = vsel %vm506_vm0, %v780_v5, 0.0  ;;  %v796_v10 = vsel %vm555_vm2, %v794_v4, %v793_v2  ;;  %v804_v19 = vsel %vm608_vm7, %v802_v13, %v801_v14 }
 0x135   : > { %v1888_v48 = vsub.f32 1.0, %v707_v46  ;;  %v797_v17 = vsel %vm558_vm5, %v796_v10, 0.0  ;;  %v787_v23 = vsel %vm395_vm10, %v785_v61, %v786_v63  ;;  %v805_v24 = vsel %vm611_vm11, %v804_v19, 0.0 }
 0x136   : > { %v1890_v49 = vsub.f32 1.0, %v706_v47  ;;  %v812_v9 = vsel %vm566_vm3, %v810_v18, %v809_v20  ;;  %v818_v26 = vrot.slane %v774_v60, 6  ;;  %v792_v11 = vadd.f32 %v787_v23, %v779_v22 }
 0x137   : > { %v795_v30 = vsel %vm555_vm2, %v793_v2, %v794_v4  ;;  %vm2095_vm0 = vcmp.ge.s32.totalorder %v1677_v1, 3  ;;  %vm2096_vm5 = vcmp.lt.s32.totalorder %v1677_v1, 2  ;;  %v826_v33 = vrot.slane %v774_v60, 7 }
 0x138   : > { %v710_v50 = vpack.c.bf16 %v1888_v48, %v1890_v49  ;;  %v813_v31 = vsel %vm2095_vm0, %v812_v9, 0.0  ;;  %v820_v32 = vsel %vm2096_vm5, %v818_v26, %v817_v25  ;;  %v800_v15 = vadd.f32 %v795_v30, %v792_v11  ;;  %vm2098_vm2 = vmmov %vm2096_vm5 }
 0x139   : > { %v803_v35 = vsel %vm608_vm7, %v801_v14, %v802_v13  ;;  %vm2097_vm10 = vcmp.ge.s32.totalorder %v1677_v1, 2  ;;  %v828_v37 = vsel %vm429_vm12, %v826_v33, %v825_v58  ;;  %v811_v40 = vsel %vm566_vm3, %v809_v20, %v810_v18 }
 0x13a   : > { %1104 = vmatmul.msk.bf16.vlgmr.msrb.gmra.mxu2 %vm361_vm14, %v710_v50  ;;  %vm2094_vm14 = vcmp.ge.s32.totalorder %v1677_v1, 6  ;;  %v821_v36 = vsel %vm2097_vm10, %v820_v32, 0.0  ;;  %v808_v38 = vadd.f32 %v803_v35, %v800_v15  ;;  %v829_v41 = vsel %vm641_vm4, %v828_v37, 0.0 }
 0x13b   : > { %v789_v8 = vsel %vm2094_vm14, %v788_v6, 0.0  ;;  %v819_v44 = vsel %vm2098_vm2, %v817_v25, %v818_v26  ;;  %v827_v47 = vsel %vm429_vm12, %v825_v58, %v826_v33  ;;  %vm881_vm3 = vcmask 0  }
 0x13c   : > { %v791_v16 = vadd.f32 %v789_v8, %v781_v7  ;;  %v816_v42 = vadd.f32 %v811_v40, %v808_v38  ;;  %v836_v55 = vsel %vm652_vm6, %v780_v5, 0.0  ;;  %v711_v56 = vrot.slane %v1890_v49, 7 }
 0x13d   : > { %v840_v62 = vsel %vm662_vm13, %v788_v6, 0.0  ;;  %v719_v63 = vrot.slane %v1890_v49, 1  ;;  %v720_v0 = vrot.slane %v1888_v48, 1  ;;  %v844_v5 = vsel %vm672_vm9, %v796_v10, 0.0 }
 0x13e   : > { %v799_v21 = vadd.f32 %v797_v17, %v791_v16  ;;  %v824_v45 = vadd.f32 %v819_v44, %v816_v42  ;;  %v848_v14 = vsel %vm678_vm1, %v804_v19, 0.0  ;;  %vm2100_vm7 = vcmp.lt.s32.totalorder %v1680_v3, 11 }
 0x13f   : > { %v721_v8 = vsel %vm440_vm15, %v719_v63, %v720_v0 }
 0x140   : > { %v807_v27 = vadd.f32 %v805_v24, %v799_v21  ;;  %v832_v50 = vadd.f32 %v827_v47, %v824_v45  ;;  %v722_v21 = vsel %vm440_vm15, %v720_v0, %v719_v63 }
 0x141   : > { %v724_v19 = vsel %vm652_vm6, %v722_v21, 0.0  ;;  %vm2104_vm6 = vcmp.lt.s32.totalorder %v1680_v3, 9 }
 0x142   : > { %v815_v34 = vadd.f32 %v813_v31, %v807_v27  ;;  %v834_v54 = vadd.f32 %v832_v50, %v774_v60 }
 0x144   : > { %v823_v39 = vadd.f32 %v821_v36, %v815_v34  ;;  %v838_v59 = vadd.f32 %v836_v55, %v834_v54 }
 0x146   : > { %v831_v43 = vadd.f32 %v829_v41, %v823_v39  ;;  %v842_v2 = vadd.f32 %v840_v62, %v838_v59 }
 0x148   : > { %v833_v46 = vadd.f32 %v831_v43, %v772_v57  ;;  %v712_v57 = vrot.slane %v1888_v48, 7  ;;  %v846_v6 = vadd.f32 %v844_v5, %v842_v2 }
 0x14a   : > { %v837_v52 = vadd.f32 %v833_v46, %v779_v22  ;;  %v714_v60 = vsel %vm429_vm12, %v712_v57, %v711_v56  ;;  %v850_v10 = vadd.f32 %v848_v14, %v846_v6  ;;  %v852_v22 = vsel %vm2100_vm7, %v812_v9, 0.0 }
 0x14b   : > { %v715_v7 = vsel %vm641_vm4, %v714_v60, 0.0  ;;  %v713_v24 = vsel %vm429_vm12, %v711_v56, %v712_v57  ;;  %vm2101_vm4 = vcmp.lt.s32.totalorder %v1680_v3, 10 }
 0x14c   : > { %v841_v51 = vadd.f32 %v837_v52, %v787_v23  ;;  %v725_v16 = vadd.f32 %v721_v8, %v715_v7  ;;  %v854_v11 = vadd.f32 %v852_v22, %v850_v10  ;;  %v856_v27 = vsel %vm2101_vm4, %v820_v32, 0.0 }
 0x14d   : > { %v726_v31 = vadd.f32 %v724_v19, %v713_v24 }
 0x14e   : > { %v845_v61 = vadd.f32 %v841_v51, %v795_v30  ;;  %v858_v33 = vadd.f32 %v856_v27, %v854_v11 }
 0x150   : > { %v849_v4 = vadd.f32 %v845_v61, %v803_v35 }
 0x152   : > { %v853_v13 = vadd.f32 %v849_v4, %v811_v40 }
 0x154   : > { %v857_v20 = vadd.f32 %v853_v13, %v819_v44 }
 0x156   : > { %v861_v26 = vadd.f32 %v857_v20, %v827_v47 }
 0x164   : > { %s1942_s17 = spop %1118 }
 0x165   : > { %v374_v53 = vstv %s1942_s17 }
 0x166   : > { %882 = vst.msk [vmem:[%s330_s6] sm:$0x1] %vm881_vm3, %v374_v53  ;;  %vm1975_vm15 = vcmp.gt.f32.partialorder %v374_v53, 0.0 }
 0x1bd   : > { %v746_v17 = vpop.f32.mrf.mxu2 }
 0x1be   : > { %v751_v18 = vadd.f32 %v746_v17, %v725_v16 }
 0x1c0   : > { %v753_v23 = vmin.f32 %v751_v18, 1.0 }
 0x1c2   : > { %v755_v25 = vsub.f32 %v753_v23, %v1890_v49  ;;  %v860_v49 = vsel %vm2104_vm6, %v828_v37, 0.0 }
 0x1c3   : > { %v862_v38 = vadd.f32 %v860_v49, %v858_v33 }
 0x1c4   : > { %v863_v30 = vmul.f32 %v861_v26, %v755_v25 }
 0x1c5   : > { %v748_v1 = vpop.f32.mrf.mxu2 }
 0x1c6   : > { %vm865_vm12 = vcmp.gt.f32.partialorder %v863_v30, 0.5  ;;  %v752_v58 = vadd.f32 %v748_v1, %v726_v31 }
 0x1c7   : > { %v1108_v15 = vsel %vm865_vm12, 1.0, %v1414_v12 }
 0x1c8   : > { %v874_v32 = vsel %vm1975_vm15, %v1733_v28, %v1108_v15  ;;  %v754_v34 = vmin.f32 %v752_v58, 1.0 }
 0x1c9   : > { %v876_v35 = vpack.c.bf16 %v874_v32, %v874_v32 }
 0x1ca   : > { %v756_v36 = vsub.f32 %v754_v34, %v1888_v48 }
 0x1cb   : > { %879 = vst.msk [vmem:[%s320_s2] sm:$0xf] %vm878_vm8, %v876_v35 }
 0x1cc   : > { %v864_v3 = vmul.f32 %v862_v38, %v756_v36 }
 0x1ce   : > { %vm866_vm11 = vcmp.gt.f32.partialorder %v864_v3, 0.5 }
 0x1cf   : > { %v1109_v28 = vsel %vm866_vm11, 1.0, %v1414_v12 }
 0x1d0   : > { %v875_v37 = vsel %vm1975_vm15, %v1736_v29, %v1109_v28 }
 0x1d1   : > { %v877_v48 = vpack.c.bf16 %v875_v37, %v875_v37 }
 0x1d3   : > { %880 = vst.msk [vmem:[%s320_s2 + $0x4] sm:$0xf] %vm878_vm8, %v877_v48 }
 0x1d4   : > { %1340 = shalt.err (!%p1337_p0)
}
 0x1d5   : > { %s1416_s9 = smov 64   ;;  %s1417_s10 = smov 4  }
 0x1d6   : > { %1128 = dma.vmem_to_hbm [thread:$0]  (%p1523_p11), %s900_s28, 128, %s902_s20, %s884_s4, %s1416_s9, %s1416_s9, %s1417_s10  }
 0x1d7 PF: > { %s2107_s16 = sld [smem:[#allocation17_spill]]  ;;  %p2110_p1 = scmp.ge.s32.totalorder %s1409_s27, 2 }
 0x1d8   : > { %s2108_s18 = sld [smem:[#allocation22_spill]] }
 0x1dd   : > { %s919_s30 = sand.u32 1, %s2107_s16  }
 0x1de   : > { %p2109_p7 = scmp.ne.s32.totalorder %s2108_s18, 0  ;;  %s920_s15 = scalar_lea.sflag [#allocation6], %s919_s30 }
 0x1e0   : > { %p1143_p8 = pnand %p2110_p1, %p2109_p7 }
 0x1e2   : > { %p1144_p3 = pneg %p1143_p8 }
 0x1e4   : > { %1380 = dma.done.wait (%p1144_p3), %s920_s15, 128  }
 0x1e5   : > { %1382 = vsyncadd (%p1144_p3), %s920_s15, 4294967168  ;;  %s2111_s27 = sld [smem:[#allocation19_spill]]  ;;  %s2115_s22 = smov %s1389_s23 }
 0x1e6   : > { %s2112_s6 = sld [smem:[#allocation18_spill]]  ;;  %s2117_s25 = smov %s1401_s0 }
 0x1e7   : > { %s2113_s24 = sld [smem:[#allocation20_spill]]  ;;  %s2118_s0 = smov %s1405_s26 }
 0x1e8   : > { %s2114_s17 = sld [smem:[#allocation24_spill]] }
 0x1eb   : > { %p30_p11 = scmp.ge.s32.totalorder %s2111_s27, 4  }
 0x1ec   : > { %s2116_s23 = smov %s2112_s6 }
 0x1ed   :  { %32 = sbr.rel (!%p30_p11) target bundleno = 18 (0x12), region = 113 }
 0x1ee   : > { %s2119_s26 = smov %s2114_s17 }
 0x1f2   :  { %932 = vsyncpa [#allocation5], 1 }
 0x1f3   :  { %934 = vsyncpa [#allocation5 + $0x1], 1 }
 0x1f4   :  { %935 = vsyncpa [#allocation8], 1 }
 0x1f5   :  { %937 = vsyncpa [#allocation8 + $0x1], 1 }
 0x1f6   :  { %938 = vsyncpa [#allocation6], 1 }
 0x1f7   :  { %940 = vsyncpa [#allocation6 + $0x1], 1 }

</bundles_post_ra>
